<compile_context>
chip_gen: v7x
topology: tpu7x:2x2x1
jax: 0.10.0
libtpu: 0.0.40
codegen_flags: <defaults>
</compile_context>

<pallas_src>
import math
import jax
import jax.numpy as jnp
from jax.experimental import pallas as pl
from jax.experimental.pallas import tpu as pltpu


def _round_up(n, m):
    return ((n + m - 1) // m) * m


# -----------------------------------------------------------------------------
# Fused kernel: all PLE levels + gates + towers in one body.
# -----------------------------------------------------------------------------
def _make_fused_kernel(*, task_num, exp_per_task, shared_num, expert_size,
                       tower_size, level_number, block_b, out_lanes,
                       compute_dtype, approx_gate_recip):
    T, E, S = task_num, exp_per_task, shared_num
    ES, TS, L = expert_size, tower_size, level_number
    e_task = E + S
    e_all = T * E + S
    A_pad = _round_up(e_all * ES, 128)   # gate-logit segment starts lane-aligned

    def _softmax(logits, approx):
        m = jnp.max(logits, axis=-1, keepdims=True)
        p = jnp.exp(logits - m)
        return p * pl.reciprocal(jnp.sum(p, axis=-1, keepdims=True), approx=approx)

    def kernel(x_ref, *refs):
        # refs = [W_lvl0, b_lvl0, ..., W_lvl{L-1}, b_lvl{L-1}, Wt1, bt1, Wt2, bt2, out]
        lvl_refs = [(refs[2 * l], refs[2 * l + 1]) for l in range(L)]
        w1_ref, b1_ref, w2_ref, b2_ref = refs[2 * L:2 * L + 4]
        out_ref = refs[2 * L + 4]

        h = x_ref[...].astype(compute_dtype)          # (B, F) at level 0

        # ---- PLE levels: ONE matmul per level ------------------------------
        for lvl in range(L):
            if_last = (lvl == L - 1)
            W_ref, b_ref = lvl_refs[lvl]
            # Level 0 fuses all streams over the shared x; later levels use a
            # block-diagonal weight over the lane-concatenated streams.
            y = jnp.dot(h, W_ref[...], preferred_element_type=jnp.float32) + b_ref[...]

            exp_all = jnp.maximum(y[:, :e_all * ES], 0.0)     # all experts, ReLU

            streams = []
            for i in range(T):
                gl = y[:, A_pad + i * e_task: A_pad + (i + 1) * e_task]
                gate = _softmax(gl, approx_gate_recip)
                acc = jnp.zeros((block_b, ES), jnp.float32)
                for j in range(E):
                    k = i * E + j
                    acc = acc + gate[:, j:j + 1] * exp_all[:, k * ES:(k + 1) * ES]
                for s in range(S):
                    k = T * E + s
                    acc = acc + gate[:, E + s:E + s + 1] * exp_all[:, k * ES:(k + 1) * ES]
                streams.append(acc)
            if not if_last:
                gl = y[:, A_pad + T * e_task: A_pad + T * e_task + e_all]
                gate = _softmax(gl, approx_gate_recip)
                acc = jnp.zeros((block_b, ES), jnp.float32)
                for k in range(e_all):
                    acc = acc + gate[:, k:k + 1] * exp_all[:, k * ES:(k + 1) * ES]
                streams.append(acc)

            # Lane-concatenate streams; feeds the next block-diagonal matmul
            # (or, after the last level, the block-diagonal tower matmul).
            h = jnp.concatenate(streams, axis=-1).astype(compute_dtype)

        # ---- Towers: two block-diagonal matmuls for ALL tasks ----------------
        h1 = jnp.maximum(
            jnp.dot(h, w1_ref[...], preferred_element_type=jnp.float32) + b1_ref[...],
            0.0)
        logits = jnp.dot(h1.astype(compute_dtype), w2_ref[...],
                         preferred_element_type=jnp.float32) + b2_ref[...]   # (B, 2T)

        pieces = []
        for t in range(T):
            sm = _softmax(logits[:, 2 * t:2 * t + 2], approx=False)  # exact output softmax
            # NOTE: in f32 the upper bound 1 - 1e-15 rounds to exactly 1.0 (matches an
            # f32 PyTorch run; differs from a float64 expectation of strictly < 1).
            pieces.append(jnp.clip(sm, 1e-15, 1.0 - 1e-15))
        pad = out_lanes - 2 * T
        if pad > 0:
            pieces.append(jnp.zeros((block_b, pad), jnp.float32))
        # Lane-dense single store (full 128-lane tiles, no masked narrow vst).
        out_ref[...] = jnp.concatenate(pieces, axis=-1).astype(out_ref.dtype)

    return kernel


# -----------------------------------------------------------------------------
# Pallas wrapper
# -----------------------------------------------------------------------------
def ple_forward(x, packed_params, *, feature_size, task_num, exp_per_task,
                shared_num, expert_size, tower_size, level_number,
                approx_gate_recip=True, block_rows=256):
    B, F = x.shape
    assert F == feature_size
    T = task_num
    out_lanes = _round_up(max(2 * T, 1), 128)

    # Batch tiling: aligned tiles; pad the batch (never block_b = B for odd B).
    # block_rows ~256 targets v5e/v6e VMEM budgets; use ~128 on v7x (64 MiB VMEM)
    # and keep grid >= 2 there so both TensorCores get work.
    block_b = block_rows if B >= block_rows else _round_up(B, 8)
    B_pad = _round_up(B, block_b)
    x_pad = jnp.pad(x, ((0, B_pad - B), (0, 0))) if B_pad != B else x
    grid = (B_pad // block_b,)

    compute_dtype = packed_params[0].dtype    # bf16 weights -> bf16 MXU operands

    kernel = _make_fused_kernel(
        task_num=task_num, exp_per_task=exp_per_task, shared_num=shared_num,
        expert_size=expert_size, tower_size=tower_size, level_number=level_number,
        block_b=block_b, out_lanes=out_lanes, compute_dtype=compute_dtype,
        approx_gate_recip=approx_gate_recip)

    x_spec = pl.BlockSpec((block_b, feature_size), lambda b: (b, 0))
    out_spec = pl.BlockSpec((block_b, out_lanes), lambda b: (b, 0))
    out_shape = jax.ShapeDtypeStruct((B_pad, out_lanes), jnp.float32)

    def _run(single_buffer_weights):
        if single_buffer_weights:
            # Constant index_map -> weights fetched once; single buffer halves
            # their resident VMEM footprint (matters on v7x's 64 MiB).
            w_specs = [pl.BlockSpec(p.shape, lambda b: (0, 0),
                                    pipeline_mode=pl.Buffered(buffer_count=1))
                       for p in packed_params]
        else:
            w_specs = [pl.BlockSpec(p.shape, lambda b: (0, 0))
                       for p in packed_params]
        return pl.pallas_call(
            kernel,
            grid=grid,
            in_specs=[x_spec] + w_specs,
            out_specs=out_spec,
            out_shape=out_shape,
            # For production sizes set pltpu.CompilerParams(vmem_limit_bytes=...)
            # explicitly (defaults are well below physical VMEM).
            compiler_params=pltpu.CompilerParams(
                dimension_semantics=("parallel",)),
        )(x_pad, *packed_params)

    try:
        out = _run(True)
    except Exception:
        # pipeline_mode / Buffered(1) not supported by this Pallas build:
        # fall back to default double-buffered weight specs.
        out = _run(False)

    return [out[:B, 2 * i:2 * (i + 1)] for i in range(T)]


# -----------------------------------------------------------------------------
# Parameter construction (deterministic, PyTorch nn.Linear-style uniform init)
# -----------------------------------------------------------------------------
def _init_linear(key, fan_in, fan_out):
    kw, kb = jax.random.split(key)
    bound = 1.0 / math.sqrt(fan_in)
    W = jax.random.uniform(kw, (fan_in, fan_out), jnp.float32, -bound, bound)
    b = jax.random.uniform(kb, (fan_out,), jnp.float32, -bound, bound)
    return W, b


def init_ple_params(key, feature_size, task_num, exp_per_task, shared_num,
                    expert_size, tower_size, level_number):
    params = {"levels": [], "towers": []}
    f_in = feature_size
    for lvl in range(level_number):
        if_last = (lvl == level_number - 1)

        te_w, te_b = [], []
        for _ in range(task_num):
            ws, bs = [], []
            for _ in range(exp_per_task):
                key, k = jax.random.split(key)
                W, b = _init_linear(k, f_in, expert_size)
                ws.append(W)
                bs.append(b.reshape(1, expert_size))
            te_w.append(ws)
            te_b.append(bs)

        se_w, se_b = [], []
        for _ in range(shared_num):
            key, k = jax.random.split(key)
            W, b = _init_linear(k, f_in, expert_size)
            se_w.append(W)
            se_b.append(b.reshape(1, expert_size))

        e_task = exp_per_task + shared_num
        g_w, g_b = [], []
        for _ in range(task_num):
            key, k = jax.random.split(key)
            W, b = _init_linear(k, f_in, e_task)
            g_w.append(W)
            g_b.append(b.reshape(1, e_task))

        level = dict(te_w=te_w, te_b=te_b, se_w=se_w, se_b=se_b,
                     g_w=g_w, g_b=g_b, if_last=if_last)
        if not if_last:
            e_all = task_num * exp_per_task + shared_num
            key, k = jax.random.split(key)
            W, b = _init_linear(k, f_in, e_all)
            level["gs_w"] = W
            level["gs_b"] = b.reshape(1, e_all)

        params["levels"].append(level)
        f_in = expert_size

    for _ in range(task_num):
        key, k1, k2 = jax.random.split(key, 3)
        W1, b1 = _init_linear(k1, expert_size, tower_size)
        W2, b2 = _init_linear(k2, tower_size, 2)
        params["towers"].append((W1, b1.reshape(1, tower_size), W2, b2.reshape(1, 2)))
    return params


# -----------------------------------------------------------------------------
# Fused parameter packing: one (W, b) per matmul.
#   level 0:  dense [F, N]       (all streams share x)
#   level>0:  block-diagonal [(T+1)*ES, N] over lane-concatenated streams
#   towers :  block-diagonal stage-1 [(T*ES, T*TS)] and stage-2 [(T*TS, 2T)]
# Column layout per level:
#   [ task0 experts | task1 experts | ... | shared experts | <pad to 128> |
#     task0 gate | task1 gate | ... | shared gate (non-last) | <pad to 128> ]
# -----------------------------------------------------------------------------
def pack_params_fused(params, *, feature_size, task_num, exp_per_task, shared_num,
                      expert_size, tower_size, level_number, dtype=jnp.bfloat16):
    T, E, S = task_num, exp_per_task, shared_num
    ES, TS, L = expert_size, tower_size, level_number
    e_task = E + S
    e_all = T * E + S
    n_streams = T + 1
    A_pad = _round_up(e_all * ES, 128)

    flat = []
    for lvl, level in enumerate(params["levels"]):
        if_last = (lvl == L - 1)
        gate_width = T * e_task + (0 if if_last else e_all)
        N = _round_up(A_pad + gate_width, 128)
        K = feature_size if lvl == 0 else n_streams * ES
        W = jnp.zeros((K, N), jnp.float32)
        b = jnp.zeros((1, N), jnp.float32)

        def rows(stream):
            if lvl == 0:
                return slice(0, K)                      # all streams share x
            return slice(stream * ES, (stream + 1) * ES)

        # experts
        for i in range(T):
            for j in range(E):
                col = (i * E + j) * ES
                W = W.at[rows(i), col:col + ES].set(level["te_w"][i][j])
                b = b.at[:, col:col + ES].set(level["te_b"][i][j])
        for s in range(S):
            col = (T * E + s) * ES
            W = W.at[rows(T), col:col + ES].set(level["se_w"][s])
            b = b.at[:, col:col + ES].set(level["se_b"][s])
        # gates
        for i in range(T):
            col = A_pad + i * e_task
            W = W.at[rows(i), col:col + e_task].set(level["g_w"][i])
            b = b.at[:, col:col + e_task].set(level["g_b"][i])
        if not if_last:
            col = A_pad + T * e_task
            W = W.at[rows(T), col:col + e_all].set(level["gs_w"])
            b = b.at[:, col:col + e_all].set(level["gs_b"])
        flat += [W.astype(dtype), b]

    # towers (block-diagonal)
    W1 = jnp.zeros((T * ES, T * TS), jnp.float32)
    b1 = jnp.zeros((1, T * TS), jnp.float32)
    W2 = jnp.zeros((T * TS, T * 2), jnp.float32)
    b2 = jnp.zeros((1, T * 2), jnp.float32)
    for i, (w1, bb1, w2, bb2) in enumerate(params["towers"]):
        W1 = W1.at[i * ES:(i + 1) * ES, i * TS:(i + 1) * TS].set(w1)
        b1 = b1.at[:, i * TS:(i + 1) * TS].set(bb1)
        W2 = W2.at[i * TS:(i + 1) * TS, i * 2:(i + 1) * 2].set(w2)
        b2 = b2.at[:, i * 2:(i + 1) * 2].set(bb2)
    flat += [W1.astype(dtype), b1, W2.astype(dtype), b2]
    return flat


# -----------------------------------------------------------------------------
# Pure-JAX reference (mirrors the PyTorch module, for correctness checks)
# -----------------------------------------------------------------------------
def _ref_forward(params, x, task_num, exp_per_task, shared_num):
    inputs = [x] * (task_num + 1)
    for level in params["levels"]:
        eo = []
        for i in range(task_num):
            for j in range(exp_per_task):
                eo.append(jax.nn.relu(inputs[i] @ level["te_w"][i][j] + level["te_b"][i][j]))
        for s in range(shared_num):
            eo.append(jax.nn.relu(inputs[-1] @ level["se_w"][s] + level["se_b"][s]))
        outs = []
        for i in range(task_num):
            gate = jax.nn.softmax(inputs[i] @ level["g_w"][i] + level["g_b"][i], axis=-1)
            cur = eo[i * exp_per_task:(i + 1) * exp_per_task] + eo[-shared_num:]
            stk = jnp.stack(cur, axis=1)
            outs.append(jnp.sum(stk * gate[:, :, None], axis=1))
        if not level["if_last"]:
            gate = jax.nn.softmax(inputs[-1] @ level["gs_w"] + level["gs_b"], axis=-1)
            stk = jnp.stack(eo, axis=1)
            outs.append(jnp.sum(stk * gate[:, :, None], axis=1))
        inputs = outs
    res = []
    for i in range(task_num):
        W1, b1, W2, b2 = params["towers"][i]
        h = jax.nn.relu(inputs[i] @ W1 + b1)
        sm = jax.nn.softmax(h @ W2 + b2, axis=-1)
        res.append(jnp.clip(sm, 1e-15, 1.0 - 1e-15))
    return res


# -----------------------------------------------------------------------------
# Main
# -----------------------------------------------------------------------------
if __name__ == "__main__":
    batch = 8
    dims = dict(feature_size=32, task_num=2, exp_per_task=2, shared_num=1,
                expert_size=16, tower_size=8, level_number=2)

    key = jax.random.PRNGKey(0)
    key, pkey, xkey = jax.random.split(key, 3)
    params = init_ple_params(pkey, **dims)
    x = jax.random.normal(xkey, (batch, dims["feature_size"]), jnp.float32)

    refs = _ref_forward(params, x, dims["task_num"], dims["exp_per_task"],
                        dims["shared_num"])

    # --- exact path: f32 weights, exact reciprocal; strict check vs reference ---
    packed_f32 = pack_params_fused(params, **dims, dtype=jnp.float32)
    outs = ple_forward(x, packed_f32, **dims, approx_gate_recip=False)
    outs = [jax.block_until_ready(o) for o in outs]
    for o, r in zip(outs, refs):
        assert o.shape == (batch, 2), o.shape
        assert jnp.allclose(o, r, atol=1e-5, rtol=1e-4), "f32 mismatch vs reference"

    # --- production path: bf16 weights/operands + approx gate reciprocal --------
    packed_bf16 = pack_params_fused(params, **dims, dtype=jnp.bfloat16)
    outs_bf16 = ple_forward(x, packed_bf16, **dims, approx_gate_recip=True)
    outs_bf16 = [jax.block_until_ready(o) for o in outs_bf16]
    for o, r in zip(outs_bf16, refs):
        assert o.shape == (batch, 2), o.shape
        assert jnp.allclose(o, r, atol=5e-2), "bf16 path diverged from reference"

    print("KERNEL_OK")
</pallas_src>

<mosaic_0001>
module attributes {stable_mosaic.version = 11 : i64} {
  func.func @kernel(%arg0: i32, %arg1: memref<8x32xf32, #tpu.memory_space<vmem>>, %arg2: memref<32x256xf32, #tpu.memory_space<vmem>>, %arg3: memref<1x256xf32, #tpu.memory_space<vmem>>, %arg4: memref<48x256xf32, #tpu.memory_space<vmem>>, %arg5: memref<1x256xf32, #tpu.memory_space<vmem>>, %arg6: memref<32x16xf32, #tpu.memory_space<vmem>>, %arg7: memref<1x16xf32, #tpu.memory_space<vmem>>, %arg8: memref<16x4xf32, #tpu.memory_space<vmem>>, %arg9: memref<1x4xf32, #tpu.memory_space<vmem>>, %arg10: memref<8x128xf32, #tpu.memory_space<vmem>>) attributes {dimension_semantics = [#tpu.dimension_semantics<parallel>], iteration_bounds = array<i64: 1>, scalar_prefetch = 0 : i64, scratch_operands = 0 : i64, tpu.core_type = #tpu.core_type<tc>, window_params = [{transform_indices = @transform_0, window_bounds = array<i64: 8, 32>}, {pipeline_mode = #tpu.pipeline_mode<synchronous>, transform_indices = @transform_1, window_bounds = array<i64: 32, 256>}, {pipeline_mode = #tpu.pipeline_mode<synchronous>, transform_indices = @transform_2, window_bounds = array<i64: 1, 256>}, {pipeline_mode = #tpu.pipeline_mode<synchronous>, transform_indices = @transform_3, window_bounds = array<i64: 48, 256>}, {pipeline_mode = #tpu.pipeline_mode<synchronous>, transform_indices = @transform_4, window_bounds = array<i64: 1, 256>}, {pipeline_mode = #tpu.pipeline_mode<synchronous>, transform_indices = @transform_5, window_bounds = array<i64: 32, 16>}, {pipeline_mode = #tpu.pipeline_mode<synchronous>, transform_indices = @transform_6, window_bounds = array<i64: 1, 16>}, {pipeline_mode = #tpu.pipeline_mode<synchronous>, transform_indices = @transform_7, window_bounds = array<i64: 16, 4>}, {pipeline_mode = #tpu.pipeline_mode<synchronous>, transform_indices = @transform_8, window_bounds = array<i64: 1, 4>}, {transform_indices = @transform_9, window_bounds = array<i64: 8, 128>}]} {
    %c0 = arith.constant 0 : index
    %c0_0 = arith.constant 0 : index
    %0 = vector.load %arg1[%c0, %c0_0] : memref<8x32xf32, #tpu.memory_space<vmem>>, vector<8x32xf32>
    %c0_1 = arith.constant 0 : index
    %c0_2 = arith.constant 0 : index
    %1 = vector.load %arg2[%c0_1, %c0_2] : memref<32x256xf32, #tpu.memory_space<vmem>>, vector<32x256xf32>
    %cst = arith.constant dense<0.000000e+00> : vector<8x256xf32>
    %2 = tpu.matmul %0, %1, %cst {dimension_numbers = #tpu.dot_dimension_numbers<[1], [0], [0], [1], [0, 0, 1, 1], [], []>} : vector<8x32xf32>, vector<32x256xf32>, vector<8x256xf32> -> vector<8x256xf32>
    %c0_3 = arith.constant 0 : index
    %c0_4 = arith.constant 0 : index
    %3 = vector.load %arg3[%c0_3, %c0_4] : memref<1x256xf32, #tpu.memory_space<vmem>>, vector<1x256xf32>
    %4 = vector.broadcast %3 : vector<1x256xf32> to vector<8x256xf32>
    %5 = arith.addf %2, %4 : vector<8x256xf32>
    %6 = vector.extract_strided_slice %5 {offsets = [0, 0], sizes = [8, 80], strides = [1, 1]} : vector<8x256xf32> to vector<8x80xf32>
    %cst_5 = arith.constant 0.000000e+00 : f32
    %7 = vector.broadcast %cst_5 : f32 to vector<8x80xf32>
    %8 = arith.maximumf %6, %7 : vector<8x80xf32>
    %9 = vector.extract_strided_slice %5 {offsets = [0, 128], sizes = [8, 3], strides = [1, 1]} : vector<8x256xf32> to vector<8x3xf32>
    %cst_6 = arith.constant dense<0xFF800000> : vector<8xf32>
    %10 = vector.multi_reduction <maximumf>, %9, %cst_6 [1] : vector<8x3xf32> to vector<8xf32>
    %11 = vector.shape_cast %10 : vector<8xf32> to vector<8x1xf32>
    %12 = vector.broadcast %11 : vector<8x1xf32> to vector<8x3xf32>
    %13 = arith.subf %9, %12 : vector<8x3xf32>
    %14 = math.exp %13 : vector<8x3xf32>
    %cst_7 = arith.constant dense<0.000000e+00> : vector<8xf32>
    %15 = vector.multi_reduction <add>, %14, %cst_7 [1] : vector<8x3xf32> to vector<8xf32>
    %16 = vector.shape_cast %15 : vector<8xf32> to vector<8x1xf32>
    %17 = tpu.reciprocal %16 : vector<8x1xf32> -> vector<8x1xf32>
    %18 = vector.broadcast %17 : vector<8x1xf32> to vector<8x3xf32>
    %19 = arith.mulf %14, %18 : vector<8x3xf32>
    %cst_8 = arith.constant 0.000000e+00 : f32
    %20 = vector.broadcast %cst_8 : f32 to vector<8x16xf32>
    %21 = vector.extract_strided_slice %19 {offsets = [0, 0], sizes = [8, 1], strides = [1, 1]} : vector<8x3xf32> to vector<8x1xf32>
    %22 = vector.extract_strided_slice %8 {offsets = [0, 0], sizes = [8, 16], strides = [1, 1]} : vector<8x80xf32> to vector<8x16xf32>
    %23 = vector.broadcast %21 : vector<8x1xf32> to vector<8x16xf32>
    %24 = arith.mulf %23, %22 : vector<8x16xf32>
    %25 = arith.addf %20, %24 : vector<8x16xf32>
    %26 = vector.extract_strided_slice %19 {offsets = [0, 1], sizes = [8, 1], strides = [1, 1]} : vector<8x3xf32> to vector<8x1xf32>
    %27 = vector.extract_strided_slice %8 {offsets = [0, 16], sizes = [8, 16], strides = [1, 1]} : vector<8x80xf32> to vector<8x16xf32>
    %28 = vector.broadcast %26 : vector<8x1xf32> to vector<8x16xf32>
    %29 = arith.mulf %28, %27 : vector<8x16xf32>
    %30 = arith.addf %25, %29 : vector<8x16xf32>
    %31 = vector.extract_strided_slice %19 {offsets = [0, 2], sizes = [8, 1], strides = [1, 1]} : vector<8x3xf32> to vector<8x1xf32>
    %32 = vector.extract_strided_slice %8 {offsets = [0, 64], sizes = [8, 16], strides = [1, 1]} : vector<8x80xf32> to vector<8x16xf32>
    %33 = vector.broadcast %31 : vector<8x1xf32> to vector<8x16xf32>
    %34 = arith.mulf %33, %32 : vector<8x16xf32>
    %35 = arith.addf %30, %34 : vector<8x16xf32>
    %36 = vector.extract_strided_slice %5 {offsets = [0, 131], sizes = [8, 3], strides = [1, 1]} : vector<8x256xf32> to vector<8x3xf32>
    %cst_9 = arith.constant dense<0xFF800000> : vector<8xf32>
    %37 = vector.multi_reduction <maximumf>, %36, %cst_9 [1] : vector<8x3xf32> to vector<8xf32>
    %38 = vector.shape_cast %37 : vector<8xf32> to vector<8x1xf32>
    %39 = vector.broadcast %38 : vector<8x1xf32> to vector<8x3xf32>
    %40 = arith.subf %36, %39 : vector<8x3xf32>
    %41 = math.exp %40 : vector<8x3xf32>
    %cst_10 = arith.constant dense<0.000000e+00> : vector<8xf32>
    %42 = vector.multi_reduction <add>, %41, %cst_10 [1] : vector<8x3xf32> to vector<8xf32>
    %43 = vector.shape_cast %42 : vector<8xf32> to vector<8x1xf32>
    %44 = tpu.reciprocal %43 : vector<8x1xf32> -> vector<8x1xf32>
    %45 = vector.broadcast %44 : vector<8x1xf32> to vector<8x3xf32>
    %46 = arith.mulf %41, %45 : vector<8x3xf32>
    %cst_11 = arith.constant 0.000000e+00 : f32
    %47 = vector.broadcast %cst_11 : f32 to vector<8x16xf32>
    %48 = vector.extract_strided_slice %46 {offsets = [0, 0], sizes = [8, 1], strides = [1, 1]} : vector<8x3xf32> to vector<8x1xf32>
    %49 = vector.extract_strided_slice %8 {offsets = [0, 32], sizes = [8, 16], strides = [1, 1]} : vector<8x80xf32> to vector<8x16xf32>
    %50 = vector.broadcast %48 : vector<8x1xf32> to vector<8x16xf32>
    %51 = arith.mulf %50, %49 : vector<8x16xf32>
    %52 = arith.addf %47, %51 : vector<8x16xf32>
    %53 = vector.extract_strided_slice %46 {offsets = [0, 1], sizes = [8, 1], strides = [1, 1]} : vector<8x3xf32> to vector<8x1xf32>
    %54 = vector.extract_strided_slice %8 {offsets = [0, 48], sizes = [8, 16], strides = [1, 1]} : vector<8x80xf32> to vector<8x16xf32>
    %55 = vector.broadcast %53 : vector<8x1xf32> to vector<8x16xf32>
    %56 = arith.mulf %55, %54 : vector<8x16xf32>
    %57 = arith.addf %52, %56 : vector<8x16xf32>
    %58 = vector.extract_strided_slice %46 {offsets = [0, 2], sizes = [8, 1], strides = [1, 1]} : vector<8x3xf32> to vector<8x1xf32>
    %59 = vector.extract_strided_slice %8 {offsets = [0, 64], sizes = [8, 16], strides = [1, 1]} : vector<8x80xf32> to vector<8x16xf32>
    %60 = vector.broadcast %58 : vector<8x1xf32> to vector<8x16xf32>
    %61 = arith.mulf %60, %59 : vector<8x16xf32>
    %62 = arith.addf %57, %61 : vector<8x16xf32>
    %63 = vector.extract_strided_slice %5 {offsets = [0, 134], sizes = [8, 5], strides = [1, 1]} : vector<8x256xf32> to vector<8x5xf32>
    %cst_12 = arith.constant dense<0xFF800000> : vector<8xf32>
    %64 = vector.multi_reduction <maximumf>, %63, %cst_12 [1] : vector<8x5xf32> to vector<8xf32>
    %65 = vector.shape_cast %64 : vector<8xf32> to vector<8x1xf32>
    %66 = vector.broadcast %65 : vector<8x1xf32> to vector<8x5xf32>
    %67 = arith.subf %63, %66 : vector<8x5xf32>
    %68 = math.exp %67 : vector<8x5xf32>
    %cst_13 = arith.constant dense<0.000000e+00> : vector<8xf32>
    %69 = vector.multi_reduction <add>, %68, %cst_13 [1] : vector<8x5xf32> to vector<8xf32>
    %70 = vector.shape_cast %69 : vector<8xf32> to vector<8x1xf32>
    %71 = tpu.reciprocal %70 : vector<8x1xf32> -> vector<8x1xf32>
    %72 = vector.broadcast %71 : vector<8x1xf32> to vector<8x5xf32>
    %73 = arith.mulf %68, %72 : vector<8x5xf32>
    %cst_14 = arith.constant 0.000000e+00 : f32
    %74 = vector.broadcast %cst_14 : f32 to vector<8x16xf32>
    %75 = vector.extract_strided_slice %73 {offsets = [0, 0], sizes = [8, 1], strides = [1, 1]} : vector<8x5xf32> to vector<8x1xf32>
    %76 = vector.extract_strided_slice %8 {offsets = [0, 0], sizes = [8, 16], strides = [1, 1]} : vector<8x80xf32> to vector<8x16xf32>
    %77 = vector.broadcast %75 : vector<8x1xf32> to vector<8x16xf32>
    %78 = arith.mulf %77, %76 : vector<8x16xf32>
    %79 = arith.addf %74, %78 : vector<8x16xf32>
    %80 = vector.extract_strided_slice %73 {offsets = [0, 1], sizes = [8, 1], strides = [1, 1]} : vector<8x5xf32> to vector<8x1xf32>
    %81 = vector.extract_strided_slice %8 {offsets = [0, 16], sizes = [8, 16], strides = [1, 1]} : vector<8x80xf32> to vector<8x16xf32>
    %82 = vector.broadcast %80 : vector<8x1xf32> to vector<8x16xf32>
    %83 = arith.mulf %82, %81 : vector<8x16xf32>
    %84 = arith.addf %79, %83 : vector<8x16xf32>
    %85 = vector.extract_strided_slice %73 {offsets = [0, 2], sizes = [8, 1], strides = [1, 1]} : vector<8x5xf32> to vector<8x1xf32>
    %86 = vector.extract_strided_slice %8 {offsets = [0, 32], sizes = [8, 16], strides = [1, 1]} : vector<8x80xf32> to vector<8x16xf32>
    %87 = vector.broadcast %85 : vector<8x1xf32> to vector<8x16xf32>
    %88 = arith.mulf %87, %86 : vector<8x16xf32>
    %89 = arith.addf %84, %88 : vector<8x16xf32>
    %90 = vector.extract_strided_slice %73 {offsets = [0, 3], sizes = [8, 1], strides = [1, 1]} : vector<8x5xf32> to vector<8x1xf32>
    %91 = vector.extract_strided_slice %8 {offsets = [0, 48], sizes = [8, 16], strides = [1, 1]} : vector<8x80xf32> to vector<8x16xf32>
    %92 = vector.broadcast %90 : vector<8x1xf32> to vector<8x16xf32>
    %93 = arith.mulf %92, %91 : vector<8x16xf32>
    %94 = arith.addf %89, %93 : vector<8x16xf32>
    %95 = vector.extract_strided_slice %73 {offsets = [0, 4], sizes = [8, 1], strides = [1, 1]} : vector<8x5xf32> to vector<8x1xf32>
    %96 = vector.extract_strided_slice %8 {offsets = [0, 64], sizes = [8, 16], strides = [1, 1]} : vector<8x80xf32> to vector<8x16xf32>
    %97 = vector.broadcast %95 : vector<8x1xf32> to vector<8x16xf32>
    %98 = arith.mulf %97, %96 : vector<8x16xf32>
    %99 = arith.addf %94, %98 : vector<8x16xf32>
    %100 = tpu.concatenate %35, %62, %99 in 1 : vector<8x16xf32>, vector<8x16xf32>, vector<8x16xf32> -> vector<8x48xf32>
    %c0_15 = arith.constant 0 : index
    %c0_16 = arith.constant 0 : index
    %101 = vector.load %arg4[%c0_15, %c0_16] : memref<48x256xf32, #tpu.memory_space<vmem>>, vector<48x256xf32>
    %cst_17 = arith.constant dense<0.000000e+00> : vector<8x256xf32>
    %102 = tpu.matmul %100, %101, %cst_17 {dimension_numbers = #tpu.dot_dimension_numbers<[1], [0], [0], [1], [0, 0, 1, 1], [], []>} : vector<8x48xf32>, vector<48x256xf32>, vector<8x256xf32> -> vector<8x256xf32>
    %c0_18 = arith.constant 0 : index
    %c0_19 = arith.constant 0 : index
    %103 = vector.load %arg5[%c0_18, %c0_19] : memref<1x256xf32, #tpu.memory_space<vmem>>, vector<1x256xf32>
    %104 = vector.broadcast %103 : vector<1x256xf32> to vector<8x256xf32>
    %105 = arith.addf %102, %104 : vector<8x256xf32>
    %106 = vector.extract_strided_slice %105 {offsets = [0, 0], sizes = [8, 80], strides = [1, 1]} : vector<8x256xf32> to vector<8x80xf32>
    %cst_20 = arith.constant 0.000000e+00 : f32
    %107 = vector.broadcast %cst_20 : f32 to vector<8x80xf32>
    %108 = arith.maximumf %106, %107 : vector<8x80xf32>
    %109 = vector.extract_strided_slice %105 {offsets = [0, 128], sizes = [8, 3], strides = [1, 1]} : vector<8x256xf32> to vector<8x3xf32>
    %cst_21 = arith.constant dense<0xFF800000> : vector<8xf32>
    %110 = vector.multi_reduction <maximumf>, %109, %cst_21 [1] : vector<8x3xf32> to vector<8xf32>
    %111 = vector.shape_cast %110 : vector<8xf32> to vector<8x1xf32>
    %112 = vector.broadcast %111 : vector<8x1xf32> to vector<8x3xf32>
    %113 = arith.subf %109, %112 : vector<8x3xf32>
    %114 = math.exp %113 : vector<8x3xf32>
    %cst_22 = arith.constant dense<0.000000e+00> : vector<8xf32>
    %115 = vector.multi_reduction <add>, %114, %cst_22 [1] : vector<8x3xf32> to vector<8xf32>
    %116 = vector.shape_cast %115 : vector<8xf32> to vector<8x1xf32>
    %117 = tpu.reciprocal %116 : vector<8x1xf32> -> vector<8x1xf32>
    %118 = vector.broadcast %117 : vector<8x1xf32> to vector<8x3xf32>
    %119 = arith.mulf %114, %118 : vector<8x3xf32>
    %cst_23 = arith.constant 0.000000e+00 : f32
    %120 = vector.broadcast %cst_23 : f32 to vector<8x16xf32>
    %121 = vector.extract_strided_slice %119 {offsets = [0, 0], sizes = [8, 1], strides = [1, 1]} : vector<8x3xf32> to vector<8x1xf32>
    %122 = vector.extract_strided_slice %108 {offsets = [0, 0], sizes = [8, 16], strides = [1, 1]} : vector<8x80xf32> to vector<8x16xf32>
    %123 = vector.broadcast %121 : vector<8x1xf32> to vector<8x16xf32>
    %124 = arith.mulf %123, %122 : vector<8x16xf32>
    %125 = arith.addf %120, %124 : vector<8x16xf32>
    %126 = vector.extract_strided_slice %119 {offsets = [0, 1], sizes = [8, 1], strides = [1, 1]} : vector<8x3xf32> to vector<8x1xf32>
    %127 = vector.extract_strided_slice %108 {offsets = [0, 16], sizes = [8, 16], strides = [1, 1]} : vector<8x80xf32> to vector<8x16xf32>
    %128 = vector.broadcast %126 : vector<8x1xf32> to vector<8x16xf32>
    %129 = arith.mulf %128, %127 : vector<8x16xf32>
    %130 = arith.addf %125, %129 : vector<8x16xf32>
    %131 = vector.extract_strided_slice %119 {offsets = [0, 2], sizes = [8, 1], strides = [1, 1]} : vector<8x3xf32> to vector<8x1xf32>
    %132 = vector.extract_strided_slice %108 {offsets = [0, 64], sizes = [8, 16], strides = [1, 1]} : vector<8x80xf32> to vector<8x16xf32>
    %133 = vector.broadcast %131 : vector<8x1xf32> to vector<8x16xf32>
    %134 = arith.mulf %133, %132 : vector<8x16xf32>
    %135 = arith.addf %130, %134 : vector<8x16xf32>
    %136 = vector.extract_strided_slice %105 {offsets = [0, 131], sizes = [8, 3], strides = [1, 1]} : vector<8x256xf32> to vector<8x3xf32>
    %cst_24 = arith.constant dense<0xFF800000> : vector<8xf32>
    %137 = vector.multi_reduction <maximumf>, %136, %cst_24 [1] : vector<8x3xf32> to vector<8xf32>
    %138 = vector.shape_cast %137 : vector<8xf32> to vector<8x1xf32>
    %139 = vector.broadcast %138 : vector<8x1xf32> to vector<8x3xf32>
    %140 = arith.subf %136, %139 : vector<8x3xf32>
    %141 = math.exp %140 : vector<8x3xf32>
    %cst_25 = arith.constant dense<0.000000e+00> : vector<8xf32>
    %142 = vector.multi_reduction <add>, %141, %cst_25 [1] : vector<8x3xf32> to vector<8xf32>
    %143 = vector.shape_cast %142 : vector<8xf32> to vector<8x1xf32>
    %144 = tpu.reciprocal %143 : vector<8x1xf32> -> vector<8x1xf32>
    %145 = vector.broadcast %144 : vector<8x1xf32> to vector<8x3xf32>
    %146 = arith.mulf %141, %145 : vector<8x3xf32>
    %cst_26 = arith.constant 0.000000e+00 : f32
    %147 = vector.broadcast %cst_26 : f32 to vector<8x16xf32>
    %148 = vector.extract_strided_slice %146 {offsets = [0, 0], sizes = [8, 1], strides = [1, 1]} : vector<8x3xf32> to vector<8x1xf32>
    %149 = vector.extract_strided_slice %108 {offsets = [0, 32], sizes = [8, 16], strides = [1, 1]} : vector<8x80xf32> to vector<8x16xf32>
    %150 = vector.broadcast %148 : vector<8x1xf32> to vector<8x16xf32>
    %151 = arith.mulf %150, %149 : vector<8x16xf32>
    %152 = arith.addf %147, %151 : vector<8x16xf32>
    %153 = vector.extract_strided_slice %146 {offsets = [0, 1], sizes = [8, 1], strides = [1, 1]} : vector<8x3xf32> to vector<8x1xf32>
    %154 = vector.extract_strided_slice %108 {offsets = [0, 48], sizes = [8, 16], strides = [1, 1]} : vector<8x80xf32> to vector<8x16xf32>
    %155 = vector.broadcast %153 : vector<8x1xf32> to vector<8x16xf32>
    %156 = arith.mulf %155, %154 : vector<8x16xf32>
    %157 = arith.addf %152, %156 : vector<8x16xf32>
    %158 = vector.extract_strided_slice %146 {offsets = [0, 2], sizes = [8, 1], strides = [1, 1]} : vector<8x3xf32> to vector<8x1xf32>
    %159 = vector.extract_strided_slice %108 {offsets = [0, 64], sizes = [8, 16], strides = [1, 1]} : vector<8x80xf32> to vector<8x16xf32>
    %160 = vector.broadcast %158 : vector<8x1xf32> to vector<8x16xf32>
    %161 = arith.mulf %160, %159 : vector<8x16xf32>
    %162 = arith.addf %157, %161 : vector<8x16xf32>
    %163 = tpu.concatenate %135, %162 in 1 : vector<8x16xf32>, vector<8x16xf32> -> vector<8x32xf32>
    %c0_27 = arith.constant 0 : index
    %c0_28 = arith.constant 0 : index
    %164 = vector.load %arg6[%c0_27, %c0_28] : memref<32x16xf32, #tpu.memory_space<vmem>>, vector<32x16xf32>
    %cst_29 = arith.constant dense<0.000000e+00> : vector<8x16xf32>
    %165 = tpu.matmul %163, %164, %cst_29 {dimension_numbers = #tpu.dot_dimension_numbers<[1], [0], [0], [1], [0, 0, 1, 1], [], []>} : vector<8x32xf32>, vector<32x16xf32>, vector<8x16xf32> -> vector<8x16xf32>
    %c0_30 = arith.constant 0 : index
    %c0_31 = arith.constant 0 : index
    %166 = vector.load %arg7[%c0_30, %c0_31] : memref<1x16xf32, #tpu.memory_space<vmem>>, vector<1x16xf32>
    %167 = vector.broadcast %166 : vector<1x16xf32> to vector<8x16xf32>
    %168 = arith.addf %165, %167 : vector<8x16xf32>
    %cst_32 = arith.constant 0.000000e+00 : f32
    %169 = vector.broadcast %cst_32 : f32 to vector<8x16xf32>
    %170 = arith.maximumf %168, %169 : vector<8x16xf32>
    %c0_33 = arith.constant 0 : index
    %c0_34 = arith.constant 0 : index
    %171 = vector.load %arg8[%c0_33, %c0_34] : memref<16x4xf32, #tpu.memory_space<vmem>>, vector<16x4xf32>
    %cst_35 = arith.constant dense<0.000000e+00> : vector<8x4xf32>
    %172 = tpu.matmul %170, %171, %cst_35 {dimension_numbers = #tpu.dot_dimension_numbers<[1], [0], [0], [1], [0, 0, 1, 1], [], []>} : vector<8x16xf32>, vector<16x4xf32>, vector<8x4xf32> -> vector<8x4xf32>
    %c0_36 = arith.constant 0 : index
    %c0_37 = arith.constant 0 : index
    %173 = vector.load %arg9[%c0_36, %c0_37] : memref<1x4xf32, #tpu.memory_space<vmem>>, vector<1x4xf32>
    %174 = vector.broadcast %173 : vector<1x4xf32> to vector<8x4xf32>
    %175 = arith.addf %172, %174 : vector<8x4xf32>
    %176 = vector.extract_strided_slice %175 {offsets = [0, 0], sizes = [8, 2], strides = [1, 1]} : vector<8x4xf32> to vector<8x2xf32>
    %cst_38 = arith.constant dense<0xFF800000> : vector<8xf32>
    %177 = vector.multi_reduction <maximumf>, %176, %cst_38 [1] : vector<8x2xf32> to vector<8xf32>
    %178 = vector.shape_cast %177 : vector<8xf32> to vector<8x1xf32>
    %179 = vector.broadcast %178 : vector<8x1xf32> to vector<8x2xf32>
    %180 = arith.subf %176, %179 : vector<8x2xf32>
    %181 = math.exp %180 : vector<8x2xf32>
    %cst_39 = arith.constant dense<0.000000e+00> : vector<8xf32>
    %182 = vector.multi_reduction <add>, %181, %cst_39 [1] : vector<8x2xf32> to vector<8xf32>
    %183 = vector.shape_cast %182 : vector<8xf32> to vector<8x1xf32>
    %184 = tpu.reciprocal %183 : vector<8x1xf32> -> vector<8x1xf32>
    %185 = vector.broadcast %184 : vector<8x1xf32> to vector<8x2xf32>
    %186 = arith.mulf %181, %185 : vector<8x2xf32>
    %cst_40 = arith.constant 1.000000e-15 : f32
    %cst_41 = arith.constant 1.000000e+00 : f32
    %187 = vector.broadcast %cst_40 : f32 to vector<8x2xf32>
    %188 = arith.maximumf %187, %186 : vector<8x2xf32>
    %189 = vector.broadcast %cst_41 : f32 to vector<8x2xf32>
    %190 = arith.minimumf %189, %188 : vector<8x2xf32>
    %191 = vector.extract_strided_slice %175 {offsets = [0, 2], sizes = [8, 2], strides = [1, 1]} : vector<8x4xf32> to vector<8x2xf32>
    %cst_42 = arith.constant dense<0xFF800000> : vector<8xf32>
    %192 = vector.multi_reduction <maximumf>, %191, %cst_42 [1] : vector<8x2xf32> to vector<8xf32>
    %193 = vector.shape_cast %192 : vector<8xf32> to vector<8x1xf32>
    %194 = vector.broadcast %193 : vector<8x1xf32> to vector<8x2xf32>
    %195 = arith.subf %191, %194 : vector<8x2xf32>
    %196 = math.exp %195 : vector<8x2xf32>
    %cst_43 = arith.constant dense<0.000000e+00> : vector<8xf32>
    %197 = vector.multi_reduction <add>, %196, %cst_43 [1] : vector<8x2xf32> to vector<8xf32>
    %198 = vector.shape_cast %197 : vector<8xf32> to vector<8x1xf32>
    %199 = tpu.reciprocal %198 : vector<8x1xf32> -> vector<8x1xf32>
    %200 = vector.broadcast %199 : vector<8x1xf32> to vector<8x2xf32>
    %201 = arith.mulf %196, %200 : vector<8x2xf32>
    %cst_44 = arith.constant 1.000000e-15 : f32
    %cst_45 = arith.constant 1.000000e+00 : f32
    %202 = vector.broadcast %cst_44 : f32 to vector<8x2xf32>
    %203 = arith.maximumf %202, %201 : vector<8x2xf32>
    %204 = vector.broadcast %cst_45 : f32 to vector<8x2xf32>
    %205 = arith.minimumf %204, %203 : vector<8x2xf32>
    %cst_46 = arith.constant 0.000000e+00 : f32
    %206 = vector.broadcast %cst_46 : f32 to vector<8x124xf32>
    %207 = tpu.concatenate %190, %205, %206 in 1 : vector<8x2xf32>, vector<8x2xf32>, vector<8x124xf32> -> vector<8x128xf32>
    %c0_47 = arith.constant 0 : index
    %c0_48 = arith.constant 0 : index
    %208 = vector.load %arg10[%c0_47, %c0_48] : memref<8x128xf32, #tpu.memory_space<vmem>>, vector<8x128xf32>
    tpu.vector_store %arg10[%c0_47, %c0_48], %207 {strides = array<i32>} : memref<8x128xf32, #tpu.memory_space<vmem>>, vector<8x128xf32>,
    return
  }
  func.func @transform_0(%arg0: i32) -> (i32, i32) {
    %c0_i32 = arith.constant 0 : i32
    %c0_i32_0 = arith.constant 0 : i32
    return %arg0, %c0_i32 : i32, i32
  }
  func.func @transform_1(%arg0: i32) -> (i32, i32) {
    %c0_i32 = arith.constant 0 : i32
    %c0_i32_0 = arith.constant 0 : i32
    %c0_i32_1 = arith.constant 0 : i32
    return %c0_i32, %c0_i32_0 : i32, i32
  }
  func.func @transform_2(%arg0: i32) -> (i32, i32) {
    %c0_i32 = arith.constant 0 : i32
    %c0_i32_0 = arith.constant 0 : i32
    %c0_i32_1 = arith.constant 0 : i32
    return %c0_i32, %c0_i32_0 : i32, i32
  }
  func.func @transform_3(%arg0: i32) -> (i32, i32) {
    %c0_i32 = arith.constant 0 : i32
    %c0_i32_0 = arith.constant 0 : i32
    %c0_i32_1 = arith.constant 0 : i32
    return %c0_i32, %c0_i32_0 : i32, i32
  }
  func.func @transform_4(%arg0: i32) -> (i32, i32) {
    %c0_i32 = arith.constant 0 : i32
    %c0_i32_0 = arith.constant 0 : i32
    %c0_i32_1 = arith.constant 0 : i32
    return %c0_i32, %c0_i32_0 : i32, i32
  }
  func.func @transform_5(%arg0: i32) -> (i32, i32) {
    %c0_i32 = arith.constant 0 : i32
    %c0_i32_0 = arith.constant 0 : i32
    %c0_i32_1 = arith.constant 0 : i32
    return %c0_i32, %c0_i32_0 : i32, i32
  }
  func.func @transform_6(%arg0: i32) -> (i32, i32) {
    %c0_i32 = arith.constant 0 : i32
    %c0_i32_0 = arith.constant 0 : i32
    %c0_i32_1 = arith.constant 0 : i32
    return %c0_i32, %c0_i32_0 : i32, i32
  }
  func.func @transform_7(%arg0: i32) -> (i32, i32) {
    %c0_i32 = arith.constant 0 : i32
    %c0_i32_0 = arith.constant 0 : i32
    %c0_i32_1 = arith.constant 0 : i32
    return %c0_i32, %c0_i32_0 : i32, i32
  }
  func.func @transform_8(%arg0: i32) -> (i32, i32) {
    %c0_i32 = arith.constant 0 : i32
    %c0_i32_0 = arith.constant 0 : i32
    %c0_i32_1 = arith.constant 0 : i32
    return %c0_i32, %c0_i32_0 : i32, i32
  }
  func.func @transform_9(%arg0: i32) -> (i32, i32) {
    %c0_i32 = arith.constant 0 : i32
    %c0_i32_0 = arith.constant 0 : i32
    return %arg0, %c0_i32 : i32, i32
  }
}

module attributes {stable_mosaic.version = 11 : i64} {
  func.func @kernel(%arg0: i32, %arg1: memref<8x32xf32, #tpu.memory_space<vmem>>, %arg2: memref<32x256xf32, #tpu.memory_space<vmem>>, %arg3: memref<1x256xf32, #tpu.memory_space<vmem>>, %arg4: memref<48x256xf32, #tpu.memory_space<vmem>>, %arg5: memref<1x256xf32, #tpu.memory_space<vmem>>, %arg6: memref<32x16xf32, #tpu.memory_space<vmem>>, %arg7: memref<1x16xf32, #tpu.memory_space<vmem>>, %arg8: memref<16x4xf32, #tpu.memory_space<vmem>>, %arg9: memref<1x4xf32, #tpu.memory_space<vmem>>, %arg10: memref<8x128xf32, #tpu.memory_space<vmem>>) attributes {dimension_semantics = [#tpu.dimension_semantics<parallel>], iteration_bounds = array<i64: 1>, scalar_prefetch = 0 : i64, scratch_operands = 0 : i64, tpu.core_type = #tpu.core_type<tc>, window_params = [{transform_indices = @transform_0, window_bounds = array<i64: 8, 32>}, {pipeline_mode = #tpu.pipeline_mode<synchronous>, transform_indices = @transform_1, window_bounds = array<i64: 32, 256>}, {pipeline_mode = #tpu.pipeline_mode<synchronous>, transform_indices = @transform_2, window_bounds = array<i64: 1, 256>}, {pipeline_mode = #tpu.pipeline_mode<synchronous>, transform_indices = @transform_3, window_bounds = array<i64: 48, 256>}, {pipeline_mode = #tpu.pipeline_mode<synchronous>, transform_indices = @transform_4, window_bounds = array<i64: 1, 256>}, {pipeline_mode = #tpu.pipeline_mode<synchronous>, transform_indices = @transform_5, window_bounds = array<i64: 32, 16>}, {pipeline_mode = #tpu.pipeline_mode<synchronous>, transform_indices = @transform_6, window_bounds = array<i64: 1, 16>}, {pipeline_mode = #tpu.pipeline_mode<synchronous>, transform_indices = @transform_7, window_bounds = array<i64: 16, 4>}, {pipeline_mode = #tpu.pipeline_mode<synchronous>, transform_indices = @transform_8, window_bounds = array<i64: 1, 4>}, {transform_indices = @transform_9, window_bounds = array<i64: 8, 128>}]} {
    %c0 = arith.constant 0 : index
    %c0_0 = arith.constant 0 : index
    %0 = vector.load %arg1[%c0, %c0_0] : memref<8x32xf32, #tpu.memory_space<vmem>>, vector<8x32xf32>
    %c0_1 = arith.constant 0 : index
    %c0_2 = arith.constant 0 : index
    %1 = vector.load %arg2[%c0_1, %c0_2] : memref<32x256xf32, #tpu.memory_space<vmem>>, vector<32x256xf32>
    %cst = arith.constant dense<0.000000e+00> : vector<8x256xf32>
    %2 = tpu.matmul %0, %1, %cst {dimension_numbers = #tpu.dot_dimension_numbers<[1], [0], [0], [1], [0, 0, 1, 1], [], []>} : vector<8x32xf32>, vector<32x256xf32>, vector<8x256xf32> -> vector<8x256xf32>
    %c0_3 = arith.constant 0 : index
    %c0_4 = arith.constant 0 : index
    %3 = vector.load %arg3[%c0_3, %c0_4] : memref<1x256xf32, #tpu.memory_space<vmem>>, vector<1x256xf32>
    %4 = vector.broadcast %3 : vector<1x256xf32> to vector<8x256xf32>
    %5 = arith.addf %2, %4 : vector<8x256xf32>
    %6 = vector.extract_strided_slice %5 {offsets = [0, 0], sizes = [8, 80], strides = [1, 1]} : vector<8x256xf32> to vector<8x80xf32>
    %cst_5 = arith.constant 0.000000e+00 : f32
    %7 = vector.broadcast %cst_5 : f32 to vector<8x80xf32>
    %8 = arith.maximumf %6, %7 : vector<8x80xf32>
    %9 = vector.extract_strided_slice %5 {offsets = [0, 128], sizes = [8, 3], strides = [1, 1]} : vector<8x256xf32> to vector<8x3xf32>
    %cst_6 = arith.constant dense<0xFF800000> : vector<8xf32>
    %10 = vector.multi_reduction <maximumf>, %9, %cst_6 [1] : vector<8x3xf32> to vector<8xf32>
    %11 = vector.shape_cast %10 : vector<8xf32> to vector<8x1xf32>
    %12 = vector.broadcast %11 : vector<8x1xf32> to vector<8x3xf32>
    %13 = arith.subf %9, %12 : vector<8x3xf32>
    %14 = math.exp %13 : vector<8x3xf32>
    %cst_7 = arith.constant dense<0.000000e+00> : vector<8xf32>
    %15 = vector.multi_reduction <add>, %14, %cst_7 [1] : vector<8x3xf32> to vector<8xf32>
    %16 = vector.shape_cast %15 : vector<8xf32> to vector<8x1xf32>
    %17 = tpu.reciprocal %16 : vector<8x1xf32> -> vector<8x1xf32>
    %18 = vector.broadcast %17 : vector<8x1xf32> to vector<8x3xf32>
    %19 = arith.mulf %14, %18 : vector<8x3xf32>
    %cst_8 = arith.constant 0.000000e+00 : f32
    %20 = vector.broadcast %cst_8 : f32 to vector<8x16xf32>
    %21 = vector.extract_strided_slice %19 {offsets = [0, 0], sizes = [8, 1], strides = [1, 1]} : vector<8x3xf32> to vector<8x1xf32>
    %22 = vector.extract_strided_slice %8 {offsets = [0, 0], sizes = [8, 16], strides = [1, 1]} : vector<8x80xf32> to vector<8x16xf32>
    %23 = vector.broadcast %21 : vector<8x1xf32> to vector<8x16xf32>
    %24 = arith.mulf %23, %22 : vector<8x16xf32>
    %25 = arith.addf %20, %24 : vector<8x16xf32>
    %26 = vector.extract_strided_slice %19 {offsets = [0, 1], sizes = [8, 1], strides = [1, 1]} : vector<8x3xf32> to vector<8x1xf32>
    %27 = vector.extract_strided_slice %8 {offsets = [0, 16], sizes = [8, 16], strides = [1, 1]} : vector<8x80xf32> to vector<8x16xf32>
    %28 = vector.broadcast %26 : vector<8x1xf32> to vector<8x16xf32>
    %29 = arith.mulf %28, %27 : vector<8x16xf32>
    %30 = arith.addf %25, %29 : vector<8x16xf32>
    %31 = vector.extract_strided_slice %19 {offsets = [0, 2], sizes = [8, 1], strides = [1, 1]} : vector<8x3xf32> to vector<8x1xf32>
    %32 = vector.extract_strided_slice %8 {offsets = [0, 64], sizes = [8, 16], strides = [1, 1]} : vector<8x80xf32> to vector<8x16xf32>
    %33 = vector.broadcast %31 : vector<8x1xf32> to vector<8x16xf32>
    %34 = arith.mulf %33, %32 : vector<8x16xf32>
    %35 = arith.addf %30, %34 : vector<8x16xf32>
    %36 = vector.extract_strided_slice %5 {offsets = [0, 131], sizes = [8, 3], strides = [1, 1]} : vector<8x256xf32> to vector<8x3xf32>
    %cst_9 = arith.constant dense<0xFF800000> : vector<8xf32>
    %37 = vector.multi_reduction <maximumf>, %36, %cst_9 [1] : vector<8x3xf32> to vector<8xf32>
    %38 = vector.shape_cast %37 : vector<8xf32> to vector<8x1xf32>
    %39 = vector.broadcast %38 : vector<8x1xf32> to vector<8x3xf32>
    %40 = arith.subf %36, %39 : vector<8x3xf32>
    %41 = math.exp %40 : vector<8x3xf32>
    %cst_10 = arith.constant dense<0.000000e+00> : vector<8xf32>
    %42 = vector.multi_reduction <add>, %41, %cst_10 [1] : vector<8x3xf32> to vector<8xf32>
    %43 = vector.shape_cast %42 : vector<8xf32> to vector<8x1xf32>
    %44 = tpu.reciprocal %43 : vector<8x1xf32> -> vector<8x1xf32>
    %45 = vector.broadcast %44 : vector<8x1xf32> to vector<8x3xf32>
    %46 = arith.mulf %41, %45 : vector<8x3xf32>
    %cst_11 = arith.constant 0.000000e+00 : f32
    %47 = vector.broadcast %cst_11 : f32 to vector<8x16xf32>
    %48 = vector.extract_strided_slice %46 {offsets = [0, 0], sizes = [8, 1], strides = [1, 1]} : vector<8x3xf32> to vector<8x1xf32>
    %49 = vector.extract_strided_slice %8 {offsets = [0, 32], sizes = [8, 16], strides = [1, 1]} : vector<8x80xf32> to vector<8x16xf32>
    %50 = vector.broadcast %48 : vector<8x1xf32> to vector<8x16xf32>
    %51 = arith.mulf %50, %49 : vector<8x16xf32>
    %52 = arith.addf %47, %51 : vector<8x16xf32>
    %53 = vector.extract_strided_slice %46 {offsets = [0, 1], sizes = [8, 1], strides = [1, 1]} : vector<8x3xf32> to vector<8x1xf32>
    %54 = vector.extract_strided_slice %8 {offsets = [0, 48], sizes = [8, 16], strides = [1, 1]} : vector<8x80xf32> to vector<8x16xf32>
    %55 = vector.broadcast %53 : vector<8x1xf32> to vector<8x16xf32>
    %56 = arith.mulf %55, %54 : vector<8x16xf32>
    %57 = arith.addf %52, %56 : vector<8x16xf32>
    %58 = vector.extract_strided_slice %46 {offsets = [0, 2], sizes = [8, 1], strides = [1, 1]} : vector<8x3xf32> to vector<8x1xf32>
    %59 = vector.extract_strided_slice %8 {offsets = [0, 64], sizes = [8, 16], strides = [1, 1]} : vector<8x80xf32> to vector<8x16xf32>
    %60 = vector.broadcast %58 : vector<8x1xf32> to vector<8x16xf32>
    %61 = arith.mulf %60, %59 : vector<8x16xf32>
    %62 = arith.addf %57, %61 : vector<8x16xf32>
    %63 = vector.extract_strided_slice %5 {offsets = [0, 134], sizes = [8, 5], strides = [1, 1]} : vector<8x256xf32> to vector<8x5xf32>
    %cst_12 = arith.constant dense<0xFF800000> : vector<8xf32>
    %64 = vector.multi_reduction <maximumf>, %63, %cst_12 [1] : vector<8x5xf32> to vector<8xf32>
    %65 = vector.shape_cast %64 : vector<8xf32> to vector<8x1xf32>
    %66 = vector.broadcast %65 : vector<8x1xf32> to vector<8x5xf32>
    %67 = arith.subf %63, %66 : vector<8x5xf32>
    %68 = math.exp %67 : vector<8x5xf32>
    %cst_13 = arith.constant dense<0.000000e+00> : vector<8xf32>
    %69 = vector.multi_reduction <add>, %68, %cst_13 [1] : vector<8x5xf32> to vector<8xf32>
    %70 = vector.shape_cast %69 : vector<8xf32> to vector<8x1xf32>
    %71 = tpu.reciprocal %70 : vector<8x1xf32> -> vector<8x1xf32>
    %72 = vector.broadcast %71 : vector<8x1xf32> to vector<8x5xf32>
    %73 = arith.mulf %68, %72 : vector<8x5xf32>
    %cst_14 = arith.constant 0.000000e+00 : f32
    %74 = vector.broadcast %cst_14 : f32 to vector<8x16xf32>
    %75 = vector.extract_strided_slice %73 {offsets = [0, 0], sizes = [8, 1], strides = [1, 1]} : vector<8x5xf32> to vector<8x1xf32>
    %76 = vector.extract_strided_slice %8 {offsets = [0, 0], sizes = [8, 16], strides = [1, 1]} : vector<8x80xf32> to vector<8x16xf32>
    %77 = vector.broadcast %75 : vector<8x1xf32> to vector<8x16xf32>
    %78 = arith.mulf %77, %76 : vector<8x16xf32>
    %79 = arith.addf %74, %78 : vector<8x16xf32>
    %80 = vector.extract_strided_slice %73 {offsets = [0, 1], sizes = [8, 1], strides = [1, 1]} : vector<8x5xf32> to vector<8x1xf32>
    %81 = vector.extract_strided_slice %8 {offsets = [0, 16], sizes = [8, 16], strides = [1, 1]} : vector<8x80xf32> to vector<8x16xf32>
    %82 = vector.broadcast %80 : vector<8x1xf32> to vector<8x16xf32>
    %83 = arith.mulf %82, %81 : vector<8x16xf32>
    %84 = arith.addf %79, %83 : vector<8x16xf32>
    %85 = vector.extract_strided_slice %73 {offsets = [0, 2], sizes = [8, 1], strides = [1, 1]} : vector<8x5xf32> to vector<8x1xf32>
    %86 = vector.extract_strided_slice %8 {offsets = [0, 32], sizes = [8, 16], strides = [1, 1]} : vector<8x80xf32> to vector<8x16xf32>
    %87 = vector.broadcast %85 : vector<8x1xf32> to vector<8x16xf32>
    %88 = arith.mulf %87, %86 : vector<8x16xf32>
    %89 = arith.addf %84, %88 : vector<8x16xf32>
    %90 = vector.extract_strided_slice %73 {offsets = [0, 3], sizes = [8, 1], strides = [1, 1]} : vector<8x5xf32> to vector<8x1xf32>
    %91 = vector.extract_strided_slice %8 {offsets = [0, 48], sizes = [8, 16], strides = [1, 1]} : vector<8x80xf32> to vector<8x16xf32>
    %92 = vector.broadcast %90 : vector<8x1xf32> to vector<8x16xf32>
    %93 = arith.mulf %92, %91 : vector<8x16xf32>
    %94 = arith.addf %89, %93 : vector<8x16xf32>
    %95 = vector.extract_strided_slice %73 {offsets = [0, 4], sizes = [8, 1], strides = [1, 1]} : vector<8x5xf32> to vector<8x1xf32>
    %96 = vector.extract_strided_slice %8 {offsets = [0, 64], sizes = [8, 16], strides = [1, 1]} : vector<8x80xf32> to vector<8x16xf32>
    %97 = vector.broadcast %95 : vector<8x1xf32> to vector<8x16xf32>
    %98 = arith.mulf %97, %96 : vector<8x16xf32>
    %99 = arith.addf %94, %98 : vector<8x16xf32>
    %100 = tpu.concatenate %35, %62, %99 in 1 : vector<8x16xf32>, vector<8x16xf32>, vector<8x16xf32> -> vector<8x48xf32>
    %c0_15 = arith.constant 0 : index
    %c0_16 = arith.constant 0 : index
    %101 = vector.load %arg4[%c0_15, %c0_16] : memref<48x256xf32, #tpu.memory_space<vmem>>, vector<48x256xf32>
    %cst_17 = arith.constant dense<0.000000e+00> : vector<8x256xf32>
    %102 = tpu.matmul %100, %101, %cst_17 {dimension_numbers = #tpu.dot_dimension_numbers<[1], [0], [0], [1], [0, 0, 1, 1], [], []>} : vector<8x48xf32>, vector<48x256xf32>, vector<8x256xf32> -> vector<8x256xf32>
    %c0_18 = arith.constant 0 : index
    %c0_19 = arith.constant 0 : index
    %103 = vector.load %arg5[%c0_18, %c0_19] : memref<1x256xf32, #tpu.memory_space<vmem>>, vector<1x256xf32>
    %104 = vector.broadcast %103 : vector<1x256xf32> to vector<8x256xf32>
    %105 = arith.addf %102, %104 : vector<8x256xf32>
    %106 = vector.extract_strided_slice %105 {offsets = [0, 0], sizes = [8, 80], strides = [1, 1]} : vector<8x256xf32> to vector<8x80xf32>
    %cst_20 = arith.constant 0.000000e+00 : f32
    %107 = vector.broadcast %cst_20 : f32 to vector<8x80xf32>
    %108 = arith.maximumf %106, %107 : vector<8x80xf32>
    %109 = vector.extract_strided_slice %105 {offsets = [0, 128], sizes = [8, 3], strides = [1, 1]} : vector<8x256xf32> to vector<8x3xf32>
    %cst_21 = arith.constant dense<0xFF800000> : vector<8xf32>
    %110 = vector.multi_reduction <maximumf>, %109, %cst_21 [1] : vector<8x3xf32> to vector<8xf32>
    %111 = vector.shape_cast %110 : vector<8xf32> to vector<8x1xf32>
    %112 = vector.broadcast %111 : vector<8x1xf32> to vector<8x3xf32>
    %113 = arith.subf %109, %112 : vector<8x3xf32>
    %114 = math.exp %113 : vector<8x3xf32>
    %cst_22 = arith.constant dense<0.000000e+00> : vector<8xf32>
    %115 = vector.multi_reduction <add>, %114, %cst_22 [1] : vector<8x3xf32> to vector<8xf32>
    %116 = vector.shape_cast %115 : vector<8xf32> to vector<8x1xf32>
    %117 = tpu.reciprocal %116 : vector<8x1xf32> -> vector<8x1xf32>
    %118 = vector.broadcast %117 : vector<8x1xf32> to vector<8x3xf32>
    %119 = arith.mulf %114, %118 : vector<8x3xf32>
    %cst_23 = arith.constant 0.000000e+00 : f32
    %120 = vector.broadcast %cst_23 : f32 to vector<8x16xf32>
    %121 = vector.extract_strided_slice %119 {offsets = [0, 0], sizes = [8, 1], strides = [1, 1]} : vector<8x3xf32> to vector<8x1xf32>
    %122 = vector.extract_strided_slice %108 {offsets = [0, 0], sizes = [8, 16], strides = [1, 1]} : vector<8x80xf32> to vector<8x16xf32>
    %123 = vector.broadcast %121 : vector<8x1xf32> to vector<8x16xf32>
    %124 = arith.mulf %123, %122 : vector<8x16xf32>
    %125 = arith.addf %120, %124 : vector<8x16xf32>
    %126 = vector.extract_strided_slice %119 {offsets = [0, 1], sizes = [8, 1], strides = [1, 1]} : vector<8x3xf32> to vector<8x1xf32>
    %127 = vector.extract_strided_slice %108 {offsets = [0, 16], sizes = [8, 16], strides = [1, 1]} : vector<8x80xf32> to vector<8x16xf32>
    %128 = vector.broadcast %126 : vector<8x1xf32> to vector<8x16xf32>
    %129 = arith.mulf %128, %127 : vector<8x16xf32>
    %130 = arith.addf %125, %129 : vector<8x16xf32>
    %131 = vector.extract_strided_slice %119 {offsets = [0, 2], sizes = [8, 1], strides = [1, 1]} : vector<8x3xf32> to vector<8x1xf32>
    %132 = vector.extract_strided_slice %108 {offsets = [0, 64], sizes = [8, 16], strides = [1, 1]} : vector<8x80xf32> to vector<8x16xf32>
    %133 = vector.broadcast %131 : vector<8x1xf32> to vector<8x16xf32>
    %134 = arith.mulf %133, %132 : vector<8x16xf32>
    %135 = arith.addf %130, %134 : vector<8x16xf32>
    %136 = vector.extract_strided_slice %105 {offsets = [0, 131], sizes = [8, 3], strides = [1, 1]} : vector<8x256xf32> to vector<8x3xf32>
    %cst_24 = arith.constant dense<0xFF800000> : vector<8xf32>
    %137 = vector.multi_reduction <maximumf>, %136, %cst_24 [1] : vector<8x3xf32> to vector<8xf32>
    %138 = vector.shape_cast %137 : vector<8xf32> to vector<8x1xf32>
    %139 = vector.broadcast %138 : vector<8x1xf32> to vector<8x3xf32>
    %140 = arith.subf %136, %139 : vector<8x3xf32>
    %141 = math.exp %140 : vector<8x3xf32>
    %cst_25 = arith.constant dense<0.000000e+00> : vector<8xf32>
    %142 = vector.multi_reduction <add>, %141, %cst_25 [1] : vector<8x3xf32> to vector<8xf32>
    %143 = vector.shape_cast %142 : vector<8xf32> to vector<8x1xf32>
    %144 = tpu.reciprocal %143 : vector<8x1xf32> -> vector<8x1xf32>
    %145 = vector.broadcast %144 : vector<8x1xf32> to vector<8x3xf32>
    %146 = arith.mulf %141, %145 : vector<8x3xf32>
    %cst_26 = arith.constant 0.000000e+00 : f32
    %147 = vector.broadcast %cst_26 : f32 to vector<8x16xf32>
    %148 = vector.extract_strided_slice %146 {offsets = [0, 0], sizes = [8, 1], strides = [1, 1]} : vector<8x3xf32> to vector<8x1xf32>
    %149 = vector.extract_strided_slice %108 {offsets = [0, 32], sizes = [8, 16], strides = [1, 1]} : vector<8x80xf32> to vector<8x16xf32>
    %150 = vector.broadcast %148 : vector<8x1xf32> to vector<8x16xf32>
    %151 = arith.mulf %150, %149 : vector<8x16xf32>
    %152 = arith.addf %147, %151 : vector<8x16xf32>
    %153 = vector.extract_strided_slice %146 {offsets = [0, 1], sizes = [8, 1], strides = [1, 1]} : vector<8x3xf32> to vector<8x1xf32>
    %154 = vector.extract_strided_slice %108 {offsets = [0, 48], sizes = [8, 16], strides = [1, 1]} : vector<8x80xf32> to vector<8x16xf32>
    %155 = vector.broadcast %153 : vector<8x1xf32> to vector<8x16xf32>
    %156 = arith.mulf %155, %154 : vector<8x16xf32>
    %157 = arith.addf %152, %156 : vector<8x16xf32>
    %158 = vector.extract_strided_slice %146 {offsets = [0, 2], sizes = [8, 1], strides = [1, 1]} : vector<8x3xf32> to vector<8x1xf32>
    %159 = vector.extract_strided_slice %108 {offsets = [0, 64], sizes = [8, 16], strides = [1, 1]} : vector<8x80xf32> to vector<8x16xf32>
    %160 = vector.broadcast %158 : vector<8x1xf32> to vector<8x16xf32>
    %161 = arith.mulf %160, %159 : vector<8x16xf32>
    %162 = arith.addf %157, %161 : vector<8x16xf32>
    %163 = tpu.concatenate %135, %162 in 1 : vector<8x16xf32>, vector<8x16xf32> -> vector<8x32xf32>
    %c0_27 = arith.constant 0 : index
    %c0_28 = arith.constant 0 : index
    %164 = vector.load %arg6[%c0_27, %c0_28] : memref<32x16xf32, #tpu.memory_space<vmem>>, vector<32x16xf32>
    %cst_29 = arith.constant dense<0.000000e+00> : vector<8x16xf32>
    %165 = tpu.matmul %163, %164, %cst_29 {dimension_numbers = #tpu.dot_dimension_numbers<[1], [0], [0], [1], [0, 0, 1, 1], [], []>} : vector<8x32xf32>, vector<32x16xf32>, vector<8x16xf32> -> vector<8x16xf32>
    %c0_30 = arith.constant 0 : index
    %c0_31 = arith.constant 0 : index
    %166 = vector.load %arg7[%c0_30, %c0_31] : memref<1x16xf32, #tpu.memory_space<vmem>>, vector<1x16xf32>
    %167 = vector.broadcast %166 : vector<1x16xf32> to vector<8x16xf32>
    %168 = arith.addf %165, %167 : vector<8x16xf32>
    %cst_32 = arith.constant 0.000000e+00 : f32
    %169 = vector.broadcast %cst_32 : f32 to vector<8x16xf32>
    %170 = arith.maximumf %168, %169 : vector<8x16xf32>
    %c0_33 = arith.constant 0 : index
    %c0_34 = arith.constant 0 : index
    %171 = vector.load %arg8[%c0_33, %c0_34] : memref<16x4xf32, #tpu.memory_space<vmem>>, vector<16x4xf32>
    %cst_35 = arith.constant dense<0.000000e+00> : vector<8x4xf32>
    %172 = tpu.matmul %170, %171, %cst_35 {dimension_numbers = #tpu.dot_dimension_numbers<[1], [0], [0], [1], [0, 0, 1, 1], [], []>} : vector<8x16xf32>, vector<16x4xf32>, vector<8x4xf32> -> vector<8x4xf32>
    %c0_36 = arith.constant 0 : index
    %c0_37 = arith.constant 0 : index
    %173 = vector.load %arg9[%c0_36, %c0_37] : memref<1x4xf32, #tpu.memory_space<vmem>>, vector<1x4xf32>
    %174 = vector.broadcast %173 : vector<1x4xf32> to vector<8x4xf32>
    %175 = arith.addf %172, %174 : vector<8x4xf32>
    %176 = vector.extract_strided_slice %175 {offsets = [0, 0], sizes = [8, 2], strides = [1, 1]} : vector<8x4xf32> to vector<8x2xf32>
    %cst_38 = arith.constant dense<0xFF800000> : vector<8xf32>
    %177 = vector.multi_reduction <maximumf>, %176, %cst_38 [1] : vector<8x2xf32> to vector<8xf32>
    %178 = vector.shape_cast %177 : vector<8xf32> to vector<8x1xf32>
    %179 = vector.broadcast %178 : vector<8x1xf32> to vector<8x2xf32>
    %180 = arith.subf %176, %179 : vector<8x2xf32>
    %181 = math.exp %180 : vector<8x2xf32>
    %cst_39 = arith.constant dense<0.000000e+00> : vector<8xf32>
    %182 = vector.multi_reduction <add>, %181, %cst_39 [1] : vector<8x2xf32> to vector<8xf32>
    %183 = vector.shape_cast %182 : vector<8xf32> to vector<8x1xf32>
    %184 = tpu.reciprocal %183 : vector<8x1xf32> -> vector<8x1xf32>
    %185 = vector.broadcast %184 : vector<8x1xf32> to vector<8x2xf32>
    %186 = arith.mulf %181, %185 : vector<8x2xf32>
    %cst_40 = arith.constant 1.000000e-15 : f32
    %cst_41 = arith.constant 1.000000e+00 : f32
    %187 = vector.broadcast %cst_40 : f32 to vector<8x2xf32>
    %188 = arith.maximumf %187, %186 : vector<8x2xf32>
    %189 = vector.broadcast %cst_41 : f32 to vector<8x2xf32>
    %190 = arith.minimumf %189, %188 : vector<8x2xf32>
    %191 = vector.extract_strided_slice %175 {offsets = [0, 2], sizes = [8, 2], strides = [1, 1]} : vector<8x4xf32> to vector<8x2xf32>
    %cst_42 = arith.constant dense<0xFF800000> : vector<8xf32>
    %192 = vector.multi_reduction <maximumf>, %191, %cst_42 [1] : vector<8x2xf32> to vector<8xf32>
    %193 = vector.shape_cast %192 : vector<8xf32> to vector<8x1xf32>
    %194 = vector.broadcast %193 : vector<8x1xf32> to vector<8x2xf32>
    %195 = arith.subf %191, %194 : vector<8x2xf32>
    %196 = math.exp %195 : vector<8x2xf32>
    %cst_43 = arith.constant dense<0.000000e+00> : vector<8xf32>
    %197 = vector.multi_reduction <add>, %196, %cst_43 [1] : vector<8x2xf32> to vector<8xf32>
    %198 = vector.shape_cast %197 : vector<8xf32> to vector<8x1xf32>
    %199 = tpu.reciprocal %198 : vector<8x1xf32> -> vector<8x1xf32>
    %200 = vector.broadcast %199 : vector<8x1xf32> to vector<8x2xf32>
    %201 = arith.mulf %196, %200 : vector<8x2xf32>
    %cst_44 = arith.constant 1.000000e-15 : f32
    %cst_45 = arith.constant 1.000000e+00 : f32
    %202 = vector.broadcast %cst_44 : f32 to vector<8x2xf32>
    %203 = arith.maximumf %202, %201 : vector<8x2xf32>
    %204 = vector.broadcast %cst_45 : f32 to vector<8x2xf32>
    %205 = arith.minimumf %204, %203 : vector<8x2xf32>
    %cst_46 = arith.constant 0.000000e+00 : f32
    %206 = vector.broadcast %cst_46 : f32 to vector<8x124xf32>
    %207 = tpu.concatenate %190, %205, %206 in 1 : vector<8x2xf32>, vector<8x2xf32>, vector<8x124xf32> -> vector<8x128xf32>
    %c0_47 = arith.constant 0 : index
    %c0_48 = arith.constant 0 : index
    %208 = vector.load %arg10[%c0_47, %c0_48] : memref<8x128xf32, #tpu.memory_space<vmem>>, vector<8x128xf32>
    tpu.vector_store %arg10[%c0_47, %c0_48], %207 {strides = array<i32>} : memref<8x128xf32, #tpu.memory_space<vmem>>, vector<8x128xf32>,
    return
  }
  func.func @transform_0(%arg0: i32) -> (i32, i32) {
    %c0_i32 = arith.constant 0 : i32
    %c0_i32_0 = arith.constant 0 : i32
    return %arg0, %c0_i32 : i32, i32
  }
  func.func @transform_1(%arg0: i32) -> (i32, i32) {
    %c0_i32 = arith.constant 0 : i32
    %c0_i32_0 = arith.constant 0 : i32
    %c0_i32_1 = arith.constant 0 : i32
    return %c0_i32, %c0_i32_0 : i32, i32
  }
  func.func @transform_2(%arg0: i32) -> (i32, i32) {
    %c0_i32 = arith.constant 0 : i32
    %c0_i32_0 = arith.constant 0 : i32
    %c0_i32_1 = arith.constant 0 : i32
    return %c0_i32, %c0_i32_0 : i32, i32
  }
  func.func @transform_3(%arg0: i32) -> (i32, i32) {
    %c0_i32 = arith.constant 0 : i32
    %c0_i32_0 = arith.constant 0 : i32
    %c0_i32_1 = arith.constant 0 : i32
    return %c0_i32, %c0_i32_0 : i32, i32
  }
  func.func @transform_4(%arg0: i32) -> (i32, i32) {
    %c0_i32 = arith.constant 0 : i32
    %c0_i32_0 = arith.constant 0 : i32
    %c0_i32_1 = arith.constant 0 : i32
    return %c0_i32, %c0_i32_0 : i32, i32
  }
  func.func @transform_5(%arg0: i32) -> (i32, i32) {
    %c0_i32 = arith.constant 0 : i32
    %c0_i32_0 = arith.constant 0 : i32
    %c0_i32_1 = arith.constant 0 : i32
    return %c0_i32, %c0_i32_0 : i32, i32
  }
  func.func @transform_6(%arg0: i32) -> (i32, i32) {
    %c0_i32 = arith.constant 0 : i32
    %c0_i32_0 = arith.constant 0 : i32
    %c0_i32_1 = arith.constant 0 : i32
    return %c0_i32, %c0_i32_0 : i32, i32
  }
  func.func @transform_7(%arg0: i32) -> (i32, i32) {
    %c0_i32 = arith.constant 0 : i32
    %c0_i32_0 = arith.constant 0 : i32
    %c0_i32_1 = arith.constant 0 : i32
    return %c0_i32, %c0_i32_0 : i32, i32
  }
  func.func @transform_8(%arg0: i32) -> (i32, i32) {
    %c0_i32 = arith.constant 0 : i32
    %c0_i32_0 = arith.constant 0 : i32
    %c0_i32_1 = arith.constant 0 : i32
    return %c0_i32, %c0_i32_0 : i32, i32
  }
  func.func @transform_9(%arg0: i32) -> (i32, i32) {
    %c0_i32 = arith.constant 0 : i32
    %c0_i32_0 = arith.constant 0 : i32
    return %arg0, %c0_i32 : i32, i32
  }
}

</mosaic_0001>

<bundles_post_ra>
// kernel: tpu_custom_call.1
= control target key start
LH: loop header
LB: loop body
LE: loop exit
PB: predicated region body
PF: predicated region fallthrough
CT: control target
= control target key end

     0   :  { %14 = vsyncpa [#allocation3], 0  ;;  %s1214_s0 = inlined_call_operand.hbm [shape: f32[8,32], index: 0, kind: input, shape index: {}]   ;;  %s1215_s1 = inlined_call_operand.vmem [shape: f32[32,256], index: 1, kind: input, shape index: {}]   ;;  %s1216_s2 = inlined_call_operand.vmem [shape: f32[1,256], index: 2, kind: input, shape index: {}]   ;;  %s1217_s3 = inlined_call_operand.hbm [shape: f32[48,256], index: 3, kind: input, shape index: {}]   ;;  %s1218_s4 = inlined_call_operand.hbm [shape: f32[1,256], index: 4, kind: input, shape index: {}]   ;;  %s1219_s5 = inlined_call_operand.vmem [shape: f32[32,16], index: 5, kind: input, shape index: {}]   ;;  %s1220_s6 = inlined_call_operand.vmem [shape: f32[1,16], index: 6, kind: input, shape index: {}]   ;;  %s1221_s7 = inlined_call_operand.vmem [shape: f32[16,4], index: 7, kind: input, shape index: {}]   ;;  %s1222_s8 = inlined_call_operand.vmem [shape: f32[1,4], index: 8, kind: input, shape index: {}]   ;;  %s1223_s9 = inlined_call_operand.hbm [shape: f32[8,128], index: 9, kind: output, shape index: {}]  }
   0x1   :  { %15 = vsyncpa [#allocation6], 0 }
   0x2   :  { %16 = vsyncpa [#allocation4], 0  ;;  %s957_s30 = smov [#allocation5]   ;;  %s863_s13 = scalar_lea.hbm %s1217_s3, 1536 }
   0x3   :  { %s36_s10 = sshll.u32 %s957_s30, 4  ;;  %p864_p0 = scmp.ne.s32.totalorder %s1217_s3, %s863_s13  ;;  %s37_s10 = int_to_ptr.vmem [resolvable:$true] %s36_s10 }
   0x4   :  { %p867_p1 = scmp.lt.u32.totalorder %s863_s13, %s1217_s3 }
   0x6   :  { %p869_p2 = pnand %p867_p1, %p864_p0 }
   0x8   :  { %872 = shalt.err (!%p869_p2)
}
   0x9   :  { %s873_s18 = scalar_lea.vmem %s37_s10, 1536  ;;  %p878_p4 = scmp.lt.s32.totalorder %s37_s10, %s37_s10 }
   0xa   :  { %p874_p3 = scmp.ne.s32.totalorder %s37_s10, %s873_s18  ;;  %p879_p5 = scmp.lt.s32.totalorder %s873_s18, %s873_s18 }
   0xc   :  { %p880_p6 = por %p879_p5, %p878_p4 }
   0xe   :  { %p881_p7 = pnand %p880_p6, %p874_p3 }
  0x10   :  { %884 = shalt.err (!%p881_p7)
}
  0x11   :  { %s958_s19 = smov 256   ;;  %s959_s20 = smov 16  }
  0x12   :  { %42 = dma.hbm_to_vmem [thread:$0]  %s1217_s3, 1536, %s37_s10, [#allocation6], %s958_s19, %s958_s19, %s959_s20  }
  0x13   :  { %s960_s23 = smov [#allocation2]   ;;  %s961_s25 = smov [#allocation7]  }
  0x14   :  { %s23_s24 = sshll.u32 %s960_s23, 4  ;;  %s49_s26 = sshll.u32 %s961_s25, 4  ;;  %s24_s24 = int_to_ptr.vmem [resolvable:$true] %s23_s24  ;;  %s50_s26 = int_to_ptr.vmem [resolvable:$true] %s49_s26 }
  0x15   :  { %s885_s29 = scalar_lea.hbm %s1214_s0, 128 }
  0x16   :  { %p886_p8 = scmp.ne.s32.totalorder %s1214_s0, %s885_s29  ;;  %p889_p9 = scmp.lt.u32.totalorder %s885_s29, %s1214_s0 }
  0x18   :  { %p891_p10 = pnand %p889_p9, %p886_p8 }
  0x1a   :  { %894 = shalt.err (!%p891_p10)
}
  0x1b   :  { %s895_s3 = scalar_lea.vmem %s24_s24, 128  ;;  %p900_p12 = scmp.lt.s32.totalorder %s24_s24, %s24_s24 }
  0x1c   :  { %p896_p11 = scmp.ne.s32.totalorder %s24_s24, %s895_s3  ;;  %p901_p13 = scmp.lt.s32.totalorder %s895_s3, %s895_s3 }
  0x1e   :  { %p902_p0 = por %p901_p13, %p900_p12 }
  0x20   :  { %p903_p1 = pnand %p902_p0, %p896_p11 }
  0x22   :  { %906 = shalt.err (!%p903_p1)
}
  0x23   :  { %26 = dma.hbm_to_vmem [thread:$0]  %s1214_s0, 128, %s24_s24, [#allocation3]  }
  0x24   :  { %s907_s17 = scalar_lea.hbm %s1218_s4, 32 }
  0x25   :  { %p908_p2 = scmp.ne.s32.totalorder %s1218_s4, %s907_s17  ;;  %p911_p3 = scmp.lt.u32.totalorder %s907_s17, %s1218_s4 }
  0x27   :  { %p913_p4 = pnand %p911_p3, %p908_p2 }
  0x29   :  { %916 = shalt.err (!%p913_p4)
}
  0x2a   :  { %s917_s22 = scalar_lea.vmem %s50_s26, 32  ;;  %p922_p6 = scmp.lt.s32.totalorder %s50_s26, %s50_s26 }
  0x2b   :  { %p918_p5 = scmp.ne.s32.totalorder %s50_s26, %s917_s22  ;;  %p923_p7 = scmp.lt.s32.totalorder %s917_s22, %s917_s22 }
  0x2d   :  { %p924_p8 = por %p923_p7, %p922_p6 }
  0x2f   :  { %p925_p9 = pnand %p924_p8, %p918_p5 }
  0x31   :  { %928 = shalt.err (!%p925_p9)
}
  0x32   :  { %52 = dma.hbm_to_vmem [thread:$0]  %s1218_s4, 32, %s50_s26, [#allocation6]  }
  0x33   :  { %951 = dma.done.wait [#allocation3], 128  }
  0x34   :  { %952 = vsyncadd [#allocation3], 4294967168 }
  0x35   :  { %953 = dma.done.wait [#allocation6], 1568  }
  0x36   :  { %954 = vsyncadd [#allocation6], 4294965728  ;;  %v962_v0 = vmov 0.0   ;;  %v72_v1 = vld [vmem:[%s1215_s1 + $0x8] sm:$0xff]  ;;  %v74_v2 = vld [vmem:[%s1215_s1 + $0x18] sm:$0xff]  ;;  %vm91_vm0 = vcmask 261120   ;;  %v81_v14 = vlaneseq }
  0x37   :  { %159 = vmatprep.mubr.f32.mxu0 %v962_v0  ;;  %416 = vmatprep.mubr.f32.mxu1 %v962_v0  ;;  %v71_v3 = vld [vmem:[%s1215_s1] sm:$0xff]  ;;  %v760_v4 = vpack.c.bf16 %v74_v2, %v72_v1  ;;  %v73_v5 = vld [vmem:[%s1215_s1 + $0x10] sm:$0xff]  ;;  %v76_v6 = vld [vmem:[%s1215_s1 + $0x28] sm:$0xff]  ;;  %vm249_vm1 = vcmask 89136   ;;  %vm206_vm2 = vcmask 48152   ;;  %vm167_vm3 = vcmask 23552  }
  0x38   :  { %v78_v7 = vld [vmem:[%s1215_s1 + $0x38] sm:$0xff]  ;;  %v762_v8 = vpack.c.bf16 %v73_v5, %v71_v3  ;;  %v75_v10 = vld [vmem:[%s1215_s1 + $0x20] sm:$0xff]  ;;  %v77_v11 = vld [vmem:[%s1215_s1 + $0x30] sm:$0xff]  ;;  %v1098_v15 = vshrl.u32 %v81_v14, 7  ;;  %s963_s1 = smov 122   ;;  %vm260_vm4 = vcmask 39936  }
  0x39   :  { %v764_v9 = vpack.c.bf16 %v78_v7, %v76_v6  ;;  %761 = vmatprep.subr.bf16.mxu0 %v760_v4  ;;  %v766_v12 = vpack.c.bf16 %v77_v11, %v75_v10  ;;  %v70_v13 = vld [vmem:[#allocation2] sm:$0xff]  ;;  %v965_v42 = vmov 8   ;;  %v966_v43 = vmov 7   ;;  %s976_s19 = smov 112   ;;  %s977_s20 = smov 96  }
  0x3a   :  { %763 = vmatpush1.bf16.msra.mxu0 %v762_v8  ;;  %v87_v16 = vsub.s32 1, %v1098_v15  ;;  %v1104_v17 = vld [vmem:[%s1216_s2] sm:$0x3]  ;;  %s964_s2 = smov 125   ;;  %818 = vset.pattern.permute.xlu1 %v965_v42  ;;  %v967_v51 = vmov 4   ;;  %v968_v52 = vmov 9  }
  0x3b   :  { %765 = vmatprep.subr.bf16.mxu0 %v764_v9  ;;  %817 = vset.pattern.permute.xlu0 %v966_v43  ;;  %v969_v53 = vmov 6   ;;  %v970_v54 = vmov 5   ;;  %v971_v57 = vmov 2   ;;  %v972_v58 = vmov 10   ;;  %s978_s21 = smov 80   ;;  %s979_s22 = smov 64  }
  0x3c   :  { %v88_v18 = vrot.slane %v1104_v17, %v87_v16  ;;  %v973_v59 = vmov 1   ;;  %v974_v60 = vmov 0   ;;  %v975_v61 = vmov 3   ;;  %s980_s0 = smov 32  }
  0x3d   :  { %v83_v62 = vsub.s32 0, %v1098_v15  ;;  %vm321_vm5 = vcmask 130048   ;;  %vm348_vm6 = vcmask 392192   ;;  %v510_v15 = vld [vmem:[%s1219_s5 + $0x8] sm:$0xff]  ;;  %vm982_vm7 = vmmov 0  }
  0x3e   :  { %767 = vmatpush1.bf16.msra.mxu0 %v766_v12  ;;  %vm690_vm8 = vcmask 31760   ;;  %vm676_vm9 = vcmask 15360   ;;  %vm709_vm10 = vcmask 31744  }
  0x3f   :  { %v84_v63 = vrot.slane %v1104_v17, %v83_v62 }
  0x41   :  { %728 = vmatmul.mubr.msk.f32.vlgmr.msra.gmra.mrb[0].mxu0 %vm91_vm0, %v70_v13 }
  0x42   :  { %750 = vmatprep.mubr.msk.f32.mxu0 %vm982_vm7, %v962_v0 }
 0x114   :  { %v1109_v19 = vpop.f32.mrb[0].mxu0 }
 0x115   :  { %v163_v20 = vpop.f32.mrb[1].mxu0  ;;  %v162_v1 = vadd.f32 %v1109_v19, %v84_v63 }
 0x116   :  { %v164_v21 = vadd.f32 %v163_v20, %v88_v18  ;;  %v325_v20 = vld [vmem:[#allocation5 + $0x8] sm:$0xff] }
 0x117   :  { %v1127_v2 = vmax.f32 %v162_v1, 0.0 }
 0x118   :  { %v250_v22 = vsel %vm249_vm1, %v164_v21, -inf  ;;  %v207_v23 = vsel %vm206_vm2, %v164_v21, -inf  ;;  %v168_v24 = vsel %vm167_vm3, %v164_v21, -inf }
 0x119   :  { %251 = vmax.xlane.f32.xlu0 %v250_v22  ;;  %v324_v22 = vld [vmem:[#allocation5] sm:$0xff] }
 0x11d   :  { %208 = vmax.xlane.f32.xlu0 %v207_v23 }
 0x121   :  { %169 = vmax.xlane.f32.xlu0 %v168_v24 }
 0x1a6   :  { %v252_v25 = vpop.xlane.xlu0 %251 }
 0x1a7   :  { %v253_v26 = vsub.f32 %v164_v21, %v252_v25  ;;  %v326_v25 = vld [vmem:[#allocation5 + $0x10] sm:$0xff] }
 0x1a9   :  { %v254_v27 = vmul.f32 1.442695, %v253_v26  ;;  %v329_v26 = vld [vmem:[#allocation5 + $0x28] sm:$0xff] }
 0x1aa   :  { %v209_v28 = vpop.xlane.xlu0 %208 }
 0x1ab   :  { %835 = vpow2.f32 %v254_v27  ;;  %v210_v29 = vsub.f32 %v164_v21, %v209_v28  ;;  %v331_v27 = vld [vmem:[#allocation5 + $0x38] sm:$0xff]  ;;  %v770_v28 = vpack.c.bf16 %v326_v25, %v324_v22 }
 0x1ad   :  { %v211_v30 = vmul.f32 1.442695, %v210_v29  ;;  %v772_v29 = vpack.c.bf16 %v331_v27, %v329_v26 }
 0x1ae   :  { %v170_v33 = vpop.xlane.xlu0 %169 }
 0x1af   :  { %837 = vpow2.f32 %v211_v30  ;;  %v171_v34 = vsub.f32 %v164_v21, %v170_v33  ;;  %v327_v21 = vld [vmem:[#allocation5 + $0x18] sm:$0xff]  ;;  %v328_v30 = vld [vmem:[#allocation5 + $0x20] sm:$0xff] }
 0x1b0   :  { %v768_v24 = vpack.c.bf16 %v327_v21, %v325_v20 }
 0x1b1   :  { %v172_v35 = vmul.f32 1.442695, %v171_v34 }
 0x1b2   :  { %769 = vmatprep.subr.bf16.mxu1 %v768_v24 }
 0x1b3   :  { %839 = vpow2.f32 %v172_v35  ;;  %771 = vmatpush1.bf16.msra.mxu1 %v770_v28  ;;  %v333_v35 = vld [vmem:[#allocation5 + $0x48] sm:$0xff] }
 0x1b4   :  { %773 = vmatprep.subr.bf16.mxu1 %v772_v29 }
 0x1b5   :  { %v836_v31 = vpop.eup %835 }
 0x1b6   :  { %257 = vrot.lane.b32.xlu1 %v836_v31, %s963_s1 }
 0x1b9   :  { %v838_v32 = vpop.eup %837 }
 0x1ba   :  { %214 = vrot.lane.b32.xlu1 %v838_v32, %s964_s2 }
 0x1bd   :  { %v840_v40 = vpop.eup %839 }
 0x1be   :  { %v174_v41 = vsel %vm167_vm3, %v840_v40, 0.0 }
 0x228   :  { %v258_v36 = vpop.permute.xlu1 %257 }
 0x229   :  { %v261_v37 = vsel %vm260_vm4, %v258_v36, 0.0  ;;  %v335_v36 = vld [vmem:[#allocation5 + $0x58] sm:$0xff] }
 0x22a   :  { %262 = vadd.xlane.f32.xlu1 %v261_v37 }
 0x22c   :  { %v215_v38 = vpop.permute.xlu1 %214 }
 0x22d   :  { %v217_v39 = vsel %vm167_vm3, %v215_v38, 0.0  ;;  %v776_v38 = vpack.c.bf16 %v335_v36, %v333_v35 }
 0x22e   :  { %218 = vadd.xlane.f32.xlu0 %v217_v39  ;;  %v332_v39 = vld [vmem:[#allocation5 + $0x40] sm:$0xff] }
 0x232   :  { %175 = vadd.xlane.f32.xlu0 %v174_v41 }
 0x2b7   :  { %v263_v44 = vpop.xlane.xlu1 %262 }
 0x2b8   :  { %841 = vrcp.f32 %v263_v44 }
 0x2bb   :  { %v219_v45 = vpop.xlane.xlu0 %218 }
 0x2bc   :  { %843 = vrcp.f32 %v219_v45 }
 0x2bf   :  { %v176_v47 = vpop.xlane.xlu0 %175 }
 0x2c0   :  { %845 = vrcp.f32 %v176_v47 }
 0x2c2   :  { %v842_v46 = vpop.eup %841 }
 0x2c3   :  { %v265_v48 = vmul.f32 %v842_v46, %v836_v31  ;;  %v330_v31 = vld [vmem:[#allocation5 + $0x30] sm:$0xff] }
 0x2c4   :  { %v774_v33 = vpack.c.bf16 %v330_v31, %v328_v30 }
 0x2c5   :  { %284 = vperm.xlu1 %818, %v265_v48   ;;  %274 = vperm.xlu0 %817, %v265_v48  }
 0x2c6   :  { %v844_v49 = vpop.eup %843  ;;  %775 = vmatpush1.bf16.msra.mxu1 %v774_v33 }
 0x2c7   :  { %v221_v50 = vmul.f32 %v844_v49, %v838_v32  ;;  %777 = vmatprep.subr.bf16.mxu1 %v776_v38  ;;  %v981_v38 = vmov 0.0|0.0  }
 0x2c8   :  { %780 = vmatprep.subr.bf16.mxu0 %v981_v38 }
 0x2c9   :  { %819 = vset.pattern.permute.xlu1 %v967_v51  ;;  %820 = vset.pattern.permute.xlu0 %v968_v52 }
 0x2ca   :  { %294 = vperm.xlu0 %820, %v265_v48   ;;  %230 = vperm.xlu1 %819, %v221_v50   ;;  %v846_v55 = vpop.eup %845 }
 0x2cb   :  { %v178_v56 = vmul.f32 %v846_v55, %v840_v40  ;;  %v334_v40 = vld [vmem:[#allocation5 + $0x50] sm:$0xff] }
 0x2cc   :  { %v778_v41 = vpack.c.bf16 %v334_v40, %v332_v39  ;;  %v512_v40 = vld [vmem:[%s1219_s5 + $0x18] sm:$0xff] }
 0x2ce   :  { %824 = vset.pattern.permute.xlu0 %v969_v53  ;;  %821 = vset.pattern.permute.xlu1 %v970_v54 }
 0x2cf   :  { %268 = vperm.xlu0 %824, %v265_v48   ;;  %240 = vperm.xlu1 %821, %v221_v50  }
 0x2d0   :  { %779 = vmatpush1.bf16.msra.mxu1 %v778_v41 }
 0x2d1   :  { %786 = vmatprep.subr.bf16.mxu1 %v981_v38 }
 0x2d3   :  { %825 = vset.pattern.permute.xlu0 %v971_v57  ;;  %822 = vset.pattern.permute.xlu1 %v972_v58 }
 0x2d4   :  { %304 = vperm.xlu1 %822, %v265_v48   ;;  %197 = vperm.xlu0 %825, %v178_v56  }
 0x2d8   :  { %823 = vset.pattern.permute.xlu1 %v973_v59  ;;  %827 = vset.pattern.permute.xlu0 %v974_v60 }
 0x2d9   :  { %187 = vperm.xlu1 %823, %v178_v56  }
 0x2dd   :  { %826 = vset.pattern.permute.xlu1 %v975_v61 }
 0x2de   :  { %224 = vperm.xlu1 %826, %v221_v50  }
 0x2e2   :  { %829 = vset.pattern.permute.xlu1 %v970_v54 }
 0x344   :  { %v285_v3 = vpop.permute.xlu1 %284  ;;  %v275_v4 = vpop.permute.xlu0 %274 }
 0x345   :  { %v277_v5 = vmul.f32 %v275_v4, %v1127_v2  ;;  %v287_v6 = vmul.f32 %v285_v3, %v1127_v2 }
 0x347   :  { %279 = vrot.lane.b32.xlu1 %v277_v5, %s976_s19 }
 0x349   :  { %v231_v7 = vpop.permute.xlu1 %230  ;;  %v295_v9 = vpop.permute.xlu0 %294 }
 0x34a   :  { %v233_v8 = vmul.f32 %v231_v7, %v1127_v2  ;;  %v297_v10 = vmul.f32 %v295_v9, %v1127_v2  ;;  %v336_v9 = vld [vmem:[#allocation7] sm:$0x3] }
 0x34b   :  { %289 = vrot.lane.b32.xlu1 %v287_v6, %s977_s20  ;;  %v341_v33 = vrot.slane %v336_v9, %v83_v62 }
 0x34c   :  { %235 = vrot.lane.b32.xlu0 %v233_v8, %s976_s19 }
 0x34e   :  { %v241_v11 = vpop.permute.xlu1 %240  ;;  %v269_v14 = vpop.permute.xlu0 %268 }
 0x34f   :  { %v243_v12 = vmul.f32 %v241_v11, %v1127_v2  ;;  %299 = vrot.lane.b32.xlu1 %v297_v10, %s978_s21  ;;  %v271_v45 = vmul.f32 %v269_v14, %v1127_v2  ;;  %v345_v10 = vrot.slane %v336_v9, %v87_v16  ;;  %v732_v9 = vld [vmem:[%s1222_s8] ss:$0 sm:$0xff] }
 0x351   :  { %245 = vrot.lane.b32.xlu0 %v243_v12, %s977_s20 }
 0x353   :  { %v305_v13 = vpop.permute.xlu1 %304  ;;  %v198_v23 = vpop.permute.xlu0 %197 }
 0x354   :  { %v307_v17 = vmul.f32 %v305_v13, %v1127_v2  ;;  %v200_v32 = vmul.f32 %v198_v23, %v1127_v2 }
 0x355   :  { %181 = vperm.xlu0 %827, %v178_v56  }
 0x356   :  { %309 = vrot.lane.b32.xlu1 %v307_v17, %s979_s22 }
 0x358   :  { %v188_v18 = vpop.permute.xlu1 %187 }
 0x359   :  { %v190_v19 = vmul.f32 %v188_v18, %v1127_v2  ;;  %828 = vset.pattern.permute.xlu0 %v967_v51 }
 0x35b   :  { %192 = vrot.lane.b32.xlu1 %v190_v19, %s976_s19 }
 0x35d   :  { %v225_v34 = vpop.permute.xlu1 %224 }
 0x35e   :  { %v227_v44 = vmul.f32 %v225_v34, %v1127_v2 }
 0x35f   :  { %202 = vrot.lane.b32.xlu1 %v200_v32, %s979_s22 }
 0x3b9   :  { %v280_v37 = vpop.permute.xlu1 %279 }
 0x3ba   :  { %v282_v47 = vadd.f32 %v280_v37, %v271_v45 }
 0x3bd   :  { %v290_v42 = vpop.permute.xlu1 %289 }
 0x3be   :  { %v236_v43 = vpop.permute.xlu0 %235  ;;  %v292_v51 = vadd.f32 %v290_v42, %v282_v47 }
 0x3bf   :  { %v238_v46 = vadd.f32 %v236_v43, %v227_v44 }
 0x3c1   :  { %v300_v49 = vpop.permute.xlu1 %299 }
 0x3c2   :  { %v302_v52 = vadd.f32 %v300_v49, %v292_v51 }
 0x3c3   :  { %v246_v48 = vpop.permute.xlu0 %245 }
 0x3c4   :  { %v248_v50 = vadd.f32 %v246_v48, %v238_v46 }
 0x3c6   :  { %314 = vrot.lane.b32.xlu0 %v248_v50, %s976_s19 }
 0x3c8   :  { %v310_v53 = vpop.permute.xlu1 %309 }
 0x3c9   :  { %v312_v55 = vadd.f32 %v310_v53, %v302_v52 }
 0x3cb   :  { %318 = vrot.lane.b32.xlu1 %v312_v55, %s980_s0 }
 0x3cd   :  { %v193_v58 = vpop.permute.xlu1 %192 }
 0x3d1   :  { %v203_v3 = vpop.permute.xlu1 %202 }
 0x3d4   :  { %v182_v56 = vpop.permute.xlu0 %181 }
 0x3d5   :  { %v184_v63 = vmul.f32 %v182_v56, %v1127_v2 }
 0x3d7   :  { %v195_v1 = vadd.f32 %v193_v58, %v184_v63 }
 0x3d9   :  { %v205_v5 = vadd.f32 %v203_v3, %v195_v1  ;;  %v595_v1 = vld [vmem:[%s1221_s7 + $0x8] sm:$0xff] }
 0x438   :  { %v315_v4 = vpop.permute.xlu0 %314 }
 0x439   :  { %v322_v6 = vsel %vm321_vm5, %v205_v5, %v315_v4  ;;  %v730_v4 = vld [vmem:[%s1220_s6] ss:$0 sm:$0xff]  ;;  %s983_s6 = smov 126  }
 0x43d   :  { %v319_v7 = vpop.permute.xlu1 %318 }
 0x43e   :  { %v323_v8 = vsel %vm91_vm0, %v322_v6, %v319_v7 }
 0x43f   :  { %729 = vmatmul.mubr.msk.f32.vlgmr.msra.gmra.mrb[0].mxu1 %vm348_vm6, %v323_v8 }
 0x440   :  { %757 = vmatprep.mubr.msk.f32.mxu1 %vm982_vm7, %v962_v0  ;;  %v594_v0 = vld [vmem:[%s1221_s7] sm:$0xff]  ;;  %s984_s7 = smov [#allocation8]  }
 0x441   :  { %v787_v3 = vpack.c.bf16 %v595_v1, %v594_v0  ;;  %s718_s8 = sshll.u32 %s984_s7, 4  ;;  %s719_s8 = int_to_ptr.vmem [resolvable:$true] %s718_s8 }
 0x442   :  { %s929_s15 = scalar_lea.vmem %s719_s8, 128  ;;  %p934_p11 = scmp.lt.s32.totalorder %s719_s8, %s719_s8 }
 0x443   :  { %788 = vmatpush3.bf16.msra.mxu1 %v787_v3  ;;  %p930_p10 = scmp.ne.s32.totalorder %s719_s8, %s929_s15  ;;  %p935_p12 = scmp.lt.s32.totalorder %s929_s15, %s929_s15 }
 0x445   :  { %p936_p13 = por %p935_p12, %p934_p11 }
 0x447   :  { %p937_p0 = pnand %p936_p13, %p930_p10 }
 0x512   :  { %v418_v11 = vpop.f32.mrb[0].mxu1 }
 0x513   :  { %v420_v12 = vpop.f32.mrb[1].mxu1  ;;  %v419_v34 = vadd.f32 %v418_v11, %v341_v33 }
 0x514   :  { %v421_v13 = vadd.f32 %v420_v12, %v345_v10 }
 0x516   :  { %v462_v2 = vsel %vm206_vm2, %v421_v13, -inf  ;;  %v424_v20 = vsel %vm167_vm3, %v421_v13, -inf }
 0x517   :  { %463 = vmax.xlane.f32.xlu0 %v462_v2 }
 0x5a4   :  { %v464_v14 = vpop.xlane.xlu0 %463 }
 0x5a5   :  { %v465_v17 = vsub.f32 %v421_v13, %v464_v14 }
 0x5a7   :  { %v466_v18 = vmul.f32 1.442695, %v465_v17 }
 0x5a9   :  { %847 = vpow2.f32 %v466_v18 }
 0x5b3   :  { %v848_v19 = vpop.eup %847 }
 0x5b4   :  { %469 = vrot.lane.b32.xlu1 %v848_v19, %s964_s2 }
 0x5d8   :  { %425 = vmax.xlane.f32.xlu1 %v424_v20 }
 0x626   :  { %v470_v21 = vpop.permute.xlu1 %469 }
 0x627   :  { %v472_v22 = vsel %vm167_vm3, %v470_v21, 0.0 }
 0x628   :  { %473 = vadd.xlane.f32.xlu0 %v472_v22 }
 0x665   :  { %v426_v16 = vpop.xlane.xlu1 %425 }
 0x666   :  { %v427_v23 = vsub.f32 %v421_v13, %v426_v16 }
 0x668   :  { %v428_v24 = vmul.f32 1.442695, %v427_v23 }
 0x66a   :  { %849 = vpow2.f32 %v428_v24 }
 0x674   :  { %v850_v25 = vpop.eup %849 }
 0x675   :  { %v430_v26 = vsel %vm167_vm3, %v850_v25, 0.0 }
 0x676   :  { %431 = vadd.xlane.f32.xlu0 %v430_v26 }
 0x6b5   :  { %v474_v27 = vpop.xlane.xlu0 %473 }
 0x6b6   :  { %851 = vrcp.f32 %v474_v27 }
 0x6c0   :  { %v852_v28 = vpop.eup %851 }
 0x6c1   :  { %v476_v29 = vmul.f32 %v852_v28, %v848_v19 }
 0x6c3   :  { %495 = vperm.xlu1 %829, %v476_v29   ;;  %485 = vperm.xlu0 %828, %v476_v29  }
 0x6c7   :  { %830 = vset.pattern.permute.xlu1 %v973_v59  ;;  %834 = vset.pattern.permute.xlu0 %v970_v54  ;;  %v423_v59 = vmax.f32 %v419_v34, 0.0 }
 0x703   :  { %v432_v30 = vpop.xlane.xlu0 %431 }
 0x704   :  { %853 = vrcp.f32 %v432_v30 }
 0x70e   :  { %v854_v31 = vpop.eup %853 }
 0x70f   :  { %v434_v32 = vmul.f32 %v854_v31, %v850_v25 }
 0x711   :  { %443 = vperm.xlu1 %830, %v434_v32  }
 0x715   :  { %831 = vset.pattern.permute.xlu1 %v975_v61 }
 0x716   :  { %479 = vperm.xlu1 %831, %v476_v29  }
 0x71a   :  { %832 = vset.pattern.permute.xlu1 %v971_v57  ;;  %v509_v57 = vld [vmem:[%s1219_s5] sm:$0xff] }
 0x71b   :  { %453 = vperm.xlu1 %832, %v434_v32   ;;  %v781_v39 = vpack.c.bf16 %v510_v15, %v509_v57 }
 0x71d   :  { %782 = vmatpush3.bf16.msra.mxu0 %v781_v39 }
 0x71e   :  { %783 = vmatprep.subr.bf16.mxu0 %v981_v38 }
 0x71f   :  { %833 = vset.pattern.permute.xlu1 %v974_v60  ;;  %v511_v60 = vld [vmem:[%s1219_s5 + $0x10] sm:$0xff] }
 0x720   :  { %v784_v41 = vpack.c.bf16 %v512_v40, %v511_v60 }
 0x722   :  { %785 = vmatpush3.bf16.msra.mxu0 %v784_v41 }
 0x742   :  { %v486_v35 = vpop.permute.xlu0 %485  ;;  %v496_v36 = vpop.permute.xlu1 %495 }
 0x743   :  { %v488_v54 = vmul.f32 %v486_v35, %v423_v59  ;;  %v498_v37 = vmul.f32 %v496_v36, %v423_v59 }
 0x745   :  { %490 = vrot.lane.b32.xlu1 %v488_v54, %s976_s19 }
 0x749   :  { %500 = vrot.lane.b32.xlu1 %v498_v37, %s977_s20 }
 0x74d   :  { %437 = vperm.xlu1 %833, %v434_v32  }
 0x790   :  { %v444_v61 = vpop.permute.xlu1 %443 }
 0x791   :  { %v446_v62 = vmul.f32 %v444_v61, %v423_v59 }
 0x793   :  { %448 = vrot.lane.b32.xlu1 %v446_v62, %s976_s19 }
 0x795   :  { %v480_v42 = vpop.permute.xlu1 %479 }
 0x796   :  { %v482_v46 = vmul.f32 %v480_v42, %v423_v59 }
 0x79a   :  { %v454_v43 = vpop.permute.xlu1 %453 }
 0x79b   :  { %v456_v44 = vmul.f32 %v454_v43, %v423_v59 }
 0x79d   :  { %458 = vrot.lane.b32.xlu0 %v456_v44, %s979_s22 }
 0x7b7   :  { %v491_v45 = vpop.permute.xlu1 %490 }
 0x7b8   :  { %v493_v47 = vadd.f32 %v491_v45, %v482_v46 }
 0x7bb   :  { %v501_v48 = vpop.permute.xlu1 %500 }
 0x7bc   :  { %v503_v49 = vadd.f32 %v501_v48, %v493_v47 }
 0x7be   :  { %505 = vrot.lane.b32.xlu1 %v503_v49, %s976_s19 }
 0x7cc   :  { %v438_v50 = vpop.permute.xlu1 %437 }
 0x7cd   :  { %v440_v52 = vmul.f32 %v438_v50, %v423_v59 }
 0x805   :  { %v449_v51 = vpop.permute.xlu1 %448 }
 0x806   :  { %v451_v55 = vadd.f32 %v449_v51, %v440_v52 }
 0x80f   :  { %v459_v53 = vpop.permute.xlu0 %458 }
 0x810   :  { %v461_v56 = vadd.f32 %v459_v53, %v451_v55 }
 0x830   :  { %v506_v58 = vpop.permute.xlu1 %505 }
 0x831   :  { %v508_v63 = vsel %vm321_vm5, %v461_v56, %v506_v58 }
 0x832   :  { %751 = vmatmul.mubr.msk.f32.vlgmr.msra.gmra.mrb[2].mxu0 %vm91_vm0, %v508_v63 }
 0x905   :  { %v589_v5 = vpop.f32.mrb[2].mxu0 }
 0x906   :  { %v590_v6 = vadd.f32 %v730_v4, %v589_v5  ;;  %v752_v7 = vpop.f32.mrb[3].mxu0 }
 0x908   :  { %v593_v8 = vmax.f32 %v590_v6, 0.0 }
 0x90a   :  { %758 = vmatmul.mubr.msk.f32.vlgmr.msra.gmra.mrb[2].mxu1 %vm321_vm5, %v593_v8 }
 0x9dd   :  { %v672_v10 = vpop.f32.mrb[2].mxu1 }
 0x9de   :  { %v673_v11 = vadd.f32 %v732_v9, %v672_v10  ;;  %v759_v12 = vpop.f32.mrb[3].mxu1 }
 0x9e0   :  { %v691_v13 = vsel %vm690_vm8, %v673_v11, -inf  ;;  %v677_v2 = vsel %vm676_vm9, %v673_v11, -inf }
 0x9e1   :  { %692 = vmax.xlane.f32.xlu0 %v691_v13  ;;  %678 = vmax.xlane.f32.xlu1 %v677_v2 }
 0xa6e   :  { %v693_v14 = vpop.xlane.xlu0 %692  ;;  %v679_v17 = vpop.xlane.xlu1 %678 }
 0xa6f   :  { %v694_v18 = vsub.f32 %v673_v11, %v693_v14  ;;  %v680_v19 = vsub.f32 %v673_v11, %v679_v17 }
 0xa71   :  { %v695_v20 = vmul.f32 1.442695, %v694_v18  ;;  %v681_v21 = vmul.f32 1.442695, %v680_v19 }
 0xa73   :  { %855 = vpow2.f32 %v695_v20 }
 0xa74   :  { %857 = vpow2.f32 %v681_v21 }
 0xa7d   :  { %v856_v22 = vpop.eup %855 }
 0xa7e   :  { %v858_v16 = vpop.eup %857  ;;  %698 = vrot.lane.b32.xlu0 %v856_v22, %s983_s6 }
 0xa7f   :  { %v683_v23 = vsel %vm676_vm9, %v858_v16, 0.0 }
 0xa80   :  { %684 = vadd.xlane.f32.xlu1 %v683_v23 }
 0xaf0   :  { %v699_v24 = vpop.permute.xlu0 %698 }
 0xaf1   :  { %v701_v25 = vsel %vm676_vm9, %v699_v24, 0.0 }
 0xaf2   :  { %702 = vadd.xlane.f32.xlu1 %v701_v25 }
 0xb0d   :  { %v685_v26 = vpop.xlane.xlu1 %684 }
 0xb0e   :  { %859 = vrcp.f32 %v685_v26 }
 0xb18   :  { %v860_v28 = vpop.eup %859 }
 0xb19   :  { %v687_v29 = vmul.f32 %v860_v28, %v858_v16 }
 0xb1b   :  { %v688_v31 = vmax.f32 %v687_v29, 1e-15 }
 0xb1d   :  { %v689_v34 = vmin.f32 %v688_v31, 1.0 }
 0xb7f   :  { %v703_v27 = vpop.xlane.xlu1 %702 }
 0xb80   :  { %861 = vrcp.f32 %v703_v27 }
 0xb8a   :  { %v862_v30 = vpop.eup %861 }
 0xb8b   :  { %v705_v32 = vmul.f32 %v862_v30, %v856_v22 }
 0xb8d   :  { %v706_v33 = vmax.f32 %v705_v32, 1e-15 }
 0xb8f   :  { %v707_v59 = vmin.f32 %v706_v33, 1.0 }
 0xb91   :  { %v708_v35 = vsel %vm676_vm9, %v689_v34, %v707_v59 }
 0xb92   :  { %v710_v54 = vsel %vm709_vm10, %v708_v35, 0.0 }
 0xb93   :  { %711 = vst [vmem:[#allocation8] sm:$0xff] %v710_v54 }
 0xb94   :  { %940 = shalt.err (!%p937_p0)
}
 0xb95   :  { %s941_s18 = scalar_lea.hbm %s1223_s9, 128 }
 0xb96   :  { %p942_p1 = scmp.ne.s32.totalorder %s1223_s9, %s941_s18  ;;  %p945_p2 = scmp.lt.u32.totalorder %s941_s18, %s1223_s9 }
 0xb98   :  { %p947_p3 = pnand %p945_p2, %p942_p1 }
 0xb9a   :  { %950 = shalt.err (!%p947_p3)
}
 0xb9b   :  { %721 = dma.vmem_to_hbm [thread:$0]  %s719_s8, 128, %s1223_s9, [#allocation4]  }
 0xb9c   :  { %955 = dma.done.wait [#allocation4], 128  }
 0xb9d   :  { %956 = vsyncadd [#allocation4], 4294967168 }
 0xb9e   :  { %725 = vsyncpa [#allocation3], 1 }
 0xb9f   :  { %726 = vsyncpa [#allocation6], 1 }
 0xba0   :  { %727 = vsyncpa [#allocation4], 1 }

// kernel: tpu_custom_call.1
= control target key start
LH: loop header
LB: loop body
LE: loop exit
PB: predicated region body
PF: predicated region fallthrough
CT: control target
= control target key end

     0   :  { %14 = vsyncpa [#allocation3], 0  ;;  %s1214_s0 = inlined_call_operand.hbm [shape: f32[8,32], index: 0, kind: input, shape index: {}]   ;;  %s1215_s1 = inlined_call_operand.vmem [shape: f32[32,256], index: 1, kind: input, shape index: {}]   ;;  %s1216_s2 = inlined_call_operand.vmem [shape: f32[1,256], index: 2, kind: input, shape index: {}]   ;;  %s1217_s3 = inlined_call_operand.hbm [shape: f32[48,256], index: 3, kind: input, shape index: {}]   ;;  %s1218_s4 = inlined_call_operand.hbm [shape: f32[1,256], index: 4, kind: input, shape index: {}]   ;;  %s1219_s5 = inlined_call_operand.vmem [shape: f32[32,16], index: 5, kind: input, shape index: {}]   ;;  %s1220_s6 = inlined_call_operand.vmem [shape: f32[1,16], index: 6, kind: input, shape index: {}]   ;;  %s1221_s7 = inlined_call_operand.vmem [shape: f32[16,4], index: 7, kind: input, shape index: {}]   ;;  %s1222_s8 = inlined_call_operand.vmem [shape: f32[1,4], index: 8, kind: input, shape index: {}]   ;;  %s1223_s9 = inlined_call_operand.hbm [shape: f32[8,128], index: 9, kind: output, shape index: {}]  }
   0x1   :  { %15 = vsyncpa [#allocation6], 0 }
   0x2   :  { %16 = vsyncpa [#allocation4], 0  ;;  %s957_s30 = smov [#allocation5]   ;;  %s863_s13 = scalar_lea.hbm %s1217_s3, 1536 }
   0x3   :  { %s36_s10 = sshll.u32 %s957_s30, 4  ;;  %p864_p0 = scmp.ne.s32.totalorder %s1217_s3, %s863_s13  ;;  %s37_s10 = int_to_ptr.vmem [resolvable:$true] %s36_s10 }
   0x4   :  { %p867_p1 = scmp.lt.u32.totalorder %s863_s13, %s1217_s3 }
   0x6   :  { %p869_p2 = pnand %p867_p1, %p864_p0 }
   0x8   :  { %872 = shalt.err (!%p869_p2)
}
   0x9   :  { %s873_s18 = scalar_lea.vmem %s37_s10, 1536  ;;  %p878_p4 = scmp.lt.s32.totalorder %s37_s10, %s37_s10 }
   0xa   :  { %p874_p3 = scmp.ne.s32.totalorder %s37_s10, %s873_s18  ;;  %p879_p5 = scmp.lt.s32.totalorder %s873_s18, %s873_s18 }
   0xc   :  { %p880_p6 = por %p879_p5, %p878_p4 }
   0xe   :  { %p881_p7 = pnand %p880_p6, %p874_p3 }
  0x10   :  { %884 = shalt.err (!%p881_p7)
}
  0x11   :  { %s958_s19 = smov 256   ;;  %s959_s20 = smov 16  }
  0x12   :  { %42 = dma.hbm_to_vmem [thread:$0]  %s1217_s3, 1536, %s37_s10, [#allocation6], %s958_s19, %s958_s19, %s959_s20  }
  0x13   :  { %s960_s23 = smov [#allocation2]   ;;  %s961_s25 = smov [#allocation7]  }
  0x14   :  { %s23_s24 = sshll.u32 %s960_s23, 4  ;;  %s49_s26 = sshll.u32 %s961_s25, 4  ;;  %s24_s24 = int_to_ptr.vmem [resolvable:$true] %s23_s24  ;;  %s50_s26 = int_to_ptr.vmem [resolvable:$true] %s49_s26 }
  0x15   :  { %s885_s29 = scalar_lea.hbm %s1214_s0, 128 }
  0x16   :  { %p886_p8 = scmp.ne.s32.totalorder %s1214_s0, %s885_s29  ;;  %p889_p9 = scmp.lt.u32.totalorder %s885_s29, %s1214_s0 }
  0x18   :  { %p891_p10 = pnand %p889_p9, %p886_p8 }
  0x1a   :  { %894 = shalt.err (!%p891_p10)
}
  0x1b   :  { %s895_s3 = scalar_lea.vmem %s24_s24, 128  ;;  %p900_p12 = scmp.lt.s32.totalorder %s24_s24, %s24_s24 }
  0x1c   :  { %p896_p11 = scmp.ne.s32.totalorder %s24_s24, %s895_s3  ;;  %p901_p13 = scmp.lt.s32.totalorder %s895_s3, %s895_s3 }
  0x1e   :  { %p902_p0 = por %p901_p13, %p900_p12 }
  0x20   :  { %p903_p1 = pnand %p902_p0, %p896_p11 }
  0x22   :  { %906 = shalt.err (!%p903_p1)
}
  0x23   :  { %26 = dma.hbm_to_vmem [thread:$0]  %s1214_s0, 128, %s24_s24, [#allocation3]  }
  0x24   :  { %s907_s17 = scalar_lea.hbm %s1218_s4, 32 }
  0x25   :  { %p908_p2 = scmp.ne.s32.totalorder %s1218_s4, %s907_s17  ;;  %p911_p3 = scmp.lt.u32.totalorder %s907_s17, %s1218_s4 }
  0x27   :  { %p913_p4 = pnand %p911_p3, %p908_p2 }
  0x29   :  { %916 = shalt.err (!%p913_p4)
}
  0x2a   :  { %s917_s22 = scalar_lea.vmem %s50_s26, 32  ;;  %p922_p6 = scmp.lt.s32.totalorder %s50_s26, %s50_s26 }
  0x2b   :  { %p918_p5 = scmp.ne.s32.totalorder %s50_s26, %s917_s22  ;;  %p923_p7 = scmp.lt.s32.totalorder %s917_s22, %s917_s22 }
  0x2d   :  { %p924_p8 = por %p923_p7, %p922_p6 }
  0x2f   :  { %p925_p9 = pnand %p924_p8, %p918_p5 }
  0x31   :  { %928 = shalt.err (!%p925_p9)
}
  0x32   :  { %52 = dma.hbm_to_vmem [thread:$0]  %s1218_s4, 32, %s50_s26, [#allocation6]  }
  0x33   :  { %951 = dma.done.wait [#allocation3], 128  }
  0x34   :  { %952 = vsyncadd [#allocation3], 4294967168 }
  0x35   :  { %953 = dma.done.wait [#allocation6], 1568  }
  0x36   :  { %954 = vsyncadd [#allocation6], 4294965728  ;;  %v962_v0 = vmov 0.0   ;;  %v72_v1 = vld [vmem:[%s1215_s1 + $0x8] sm:$0xff]  ;;  %v74_v2 = vld [vmem:[%s1215_s1 + $0x18] sm:$0xff]  ;;  %vm91_vm0 = vcmask 261120   ;;  %v81_v14 = vlaneseq }
  0x37   :  { %159 = vmatprep.mubr.f32.mxu0 %v962_v0  ;;  %416 = vmatprep.mubr.f32.mxu1 %v962_v0  ;;  %v71_v3 = vld [vmem:[%s1215_s1] sm:$0xff]  ;;  %v760_v4 = vpack.c.bf16 %v74_v2, %v72_v1  ;;  %v73_v5 = vld [vmem:[%s1215_s1 + $0x10] sm:$0xff]  ;;  %v76_v6 = vld [vmem:[%s1215_s1 + $0x28] sm:$0xff]  ;;  %vm249_vm1 = vcmask 89136   ;;  %vm206_vm2 = vcmask 48152   ;;  %vm167_vm3 = vcmask 23552  }
  0x38   :  { %v78_v7 = vld [vmem:[%s1215_s1 + $0x38] sm:$0xff]  ;;  %v762_v8 = vpack.c.bf16 %v73_v5, %v71_v3  ;;  %v75_v10 = vld [vmem:[%s1215_s1 + $0x20] sm:$0xff]  ;;  %v77_v11 = vld [vmem:[%s1215_s1 + $0x30] sm:$0xff]  ;;  %v1098_v15 = vshrl.u32 %v81_v14, 7  ;;  %s963_s1 = smov 122   ;;  %vm260_vm4 = vcmask 39936  }
  0x39   :  { %v764_v9 = vpack.c.bf16 %v78_v7, %v76_v6  ;;  %761 = vmatprep.subr.bf16.mxu0 %v760_v4  ;;  %v766_v12 = vpack.c.bf16 %v77_v11, %v75_v10  ;;  %v70_v13 = vld [vmem:[#allocation2] sm:$0xff]  ;;  %v965_v42 = vmov 8   ;;  %v966_v43 = vmov 7   ;;  %s976_s19 = smov 112   ;;  %s977_s20 = smov 96  }
  0x3a   :  { %763 = vmatpush1.bf16.msra.mxu0 %v762_v8  ;;  %v87_v16 = vsub.s32 1, %v1098_v15  ;;  %v1104_v17 = vld [vmem:[%s1216_s2] sm:$0x3]  ;;  %s964_s2 = smov 125   ;;  %818 = vset.pattern.permute.xlu1 %v965_v42  ;;  %v967_v51 = vmov 4   ;;  %v968_v52 = vmov 9  }
  0x3b   :  { %765 = vmatprep.subr.bf16.mxu0 %v764_v9  ;;  %817 = vset.pattern.permute.xlu0 %v966_v43  ;;  %v969_v53 = vmov 6   ;;  %v970_v54 = vmov 5   ;;  %v971_v57 = vmov 2   ;;  %v972_v58 = vmov 10   ;;  %s978_s21 = smov 80   ;;  %s979_s22 = smov 64  }
  0x3c   :  { %v88_v18 = vrot.slane %v1104_v17, %v87_v16  ;;  %v973_v59 = vmov 1   ;;  %v974_v60 = vmov 0   ;;  %v975_v61 = vmov 3   ;;  %s980_s0 = smov 32  }
  0x3d   :  { %v83_v62 = vsub.s32 0, %v1098_v15  ;;  %vm321_vm5 = vcmask 130048   ;;  %vm348_vm6 = vcmask 392192   ;;  %v510_v15 = vld [vmem:[%s1219_s5 + $0x8] sm:$0xff]  ;;  %vm982_vm7 = vmmov 0  }
  0x3e   :  { %767 = vmatpush1.bf16.msra.mxu0 %v766_v12  ;;  %vm690_vm8 = vcmask 31760   ;;  %vm676_vm9 = vcmask 15360   ;;  %vm709_vm10 = vcmask 31744  }
  0x3f   :  { %v84_v63 = vrot.slane %v1104_v17, %v83_v62 }
  0x41   :  { %728 = vmatmul.mubr.msk.f32.vlgmr.msra.gmra.mrb[0].mxu0 %vm91_vm0, %v70_v13 }
  0x42   :  { %750 = vmatprep.mubr.msk.f32.mxu0 %vm982_vm7, %v962_v0 }
 0x114   :  { %v1109_v19 = vpop.f32.mrb[0].mxu0 }
 0x115   :  { %v163_v20 = vpop.f32.mrb[1].mxu0  ;;  %v162_v1 = vadd.f32 %v1109_v19, %v84_v63 }
 0x116   :  { %v164_v21 = vadd.f32 %v163_v20, %v88_v18  ;;  %v325_v20 = vld [vmem:[#allocation5 + $0x8] sm:$0xff] }
 0x117   :  { %v1127_v2 = vmax.f32 %v162_v1, 0.0 }
 0x118   :  { %v250_v22 = vsel %vm249_vm1, %v164_v21, -inf  ;;  %v207_v23 = vsel %vm206_vm2, %v164_v21, -inf  ;;  %v168_v24 = vsel %vm167_vm3, %v164_v21, -inf }
 0x119   :  { %251 = vmax.xlane.f32.xlu0 %v250_v22  ;;  %v324_v22 = vld [vmem:[#allocation5] sm:$0xff] }
 0x11d   :  { %208 = vmax.xlane.f32.xlu0 %v207_v23 }
 0x121   :  { %169 = vmax.xlane.f32.xlu0 %v168_v24 }
 0x1a6   :  { %v252_v25 = vpop.xlane.xlu0 %251 }
 0x1a7   :  { %v253_v26 = vsub.f32 %v164_v21, %v252_v25  ;;  %v326_v25 = vld [vmem:[#allocation5 + $0x10] sm:$0xff] }
 0x1a9   :  { %v254_v27 = vmul.f32 1.442695, %v253_v26  ;;  %v329_v26 = vld [vmem:[#allocation5 + $0x28] sm:$0xff] }
 0x1aa   :  { %v209_v28 = vpop.xlane.xlu0 %208 }
 0x1ab   :  { %835 = vpow2.f32 %v254_v27  ;;  %v210_v29 = vsub.f32 %v164_v21, %v209_v28  ;;  %v331_v27 = vld [vmem:[#allocation5 + $0x38] sm:$0xff]  ;;  %v770_v28 = vpack.c.bf16 %v326_v25, %v324_v22 }
 0x1ad   :  { %v211_v30 = vmul.f32 1.442695, %v210_v29  ;;  %v772_v29 = vpack.c.bf16 %v331_v27, %v329_v26 }
 0x1ae   :  { %v170_v33 = vpop.xlane.xlu0 %169 }
 0x1af   :  { %837 = vpow2.f32 %v211_v30  ;;  %v171_v34 = vsub.f32 %v164_v21, %v170_v33  ;;  %v327_v21 = vld [vmem:[#allocation5 + $0x18] sm:$0xff]  ;;  %v328_v30 = vld [vmem:[#allocation5 + $0x20] sm:$0xff] }
 0x1b0   :  { %v768_v24 = vpack.c.bf16 %v327_v21, %v325_v20 }
 0x1b1   :  { %v172_v35 = vmul.f32 1.442695, %v171_v34 }
 0x1b2   :  { %769 = vmatprep.subr.bf16.mxu1 %v768_v24 }
 0x1b3   :  { %839 = vpow2.f32 %v172_v35  ;;  %771 = vmatpush1.bf16.msra.mxu1 %v770_v28  ;;  %v333_v35 = vld [vmem:[#allocation5 + $0x48] sm:$0xff] }
 0x1b4   :  { %773 = vmatprep.subr.bf16.mxu1 %v772_v29 }
 0x1b5   :  { %v836_v31 = vpop.eup %835 }
 0x1b6   :  { %257 = vrot.lane.b32.xlu1 %v836_v31, %s963_s1 }
 0x1b9   :  { %v838_v32 = vpop.eup %837 }
 0x1ba   :  { %214 = vrot.lane.b32.xlu1 %v838_v32, %s964_s2 }
 0x1bd   :  { %v840_v40 = vpop.eup %839 }
 0x1be   :  { %v174_v41 = vsel %vm167_vm3, %v840_v40, 0.0 }
 0x228   :  { %v258_v36 = vpop.permute.xlu1 %257 }
 0x229   :  { %v261_v37 = vsel %vm260_vm4, %v258_v36, 0.0  ;;  %v335_v36 = vld [vmem:[#allocation5 + $0x58] sm:$0xff] }
 0x22a   :  { %262 = vadd.xlane.f32.xlu1 %v261_v37 }
 0x22c   :  { %v215_v38 = vpop.permute.xlu1 %214 }
 0x22d   :  { %v217_v39 = vsel %vm167_vm3, %v215_v38, 0.0  ;;  %v776_v38 = vpack.c.bf16 %v335_v36, %v333_v35 }
 0x22e   :  { %218 = vadd.xlane.f32.xlu0 %v217_v39  ;;  %v332_v39 = vld [vmem:[#allocation5 + $0x40] sm:$0xff] }
 0x232   :  { %175 = vadd.xlane.f32.xlu0 %v174_v41 }
 0x2b7   :  { %v263_v44 = vpop.xlane.xlu1 %262 }
 0x2b8   :  { %841 = vrcp.f32 %v263_v44 }
 0x2bb   :  { %v219_v45 = vpop.xlane.xlu0 %218 }
 0x2bc   :  { %843 = vrcp.f32 %v219_v45 }
 0x2bf   :  { %v176_v47 = vpop.xlane.xlu0 %175 }
 0x2c0   :  { %845 = vrcp.f32 %v176_v47 }
 0x2c2   :  { %v842_v46 = vpop.eup %841 }
 0x2c3   :  { %v265_v48 = vmul.f32 %v842_v46, %v836_v31  ;;  %v330_v31 = vld [vmem:[#allocation5 + $0x30] sm:$0xff] }
 0x2c4   :  { %v774_v33 = vpack.c.bf16 %v330_v31, %v328_v30 }
 0x2c5   :  { %284 = vperm.xlu1 %818, %v265_v48   ;;  %274 = vperm.xlu0 %817, %v265_v48  }
 0x2c6   :  { %v844_v49 = vpop.eup %843  ;;  %775 = vmatpush1.bf16.msra.mxu1 %v774_v33 }
 0x2c7   :  { %v221_v50 = vmul.f32 %v844_v49, %v838_v32  ;;  %777 = vmatprep.subr.bf16.mxu1 %v776_v38  ;;  %v981_v38 = vmov 0.0|0.0  }
 0x2c8   :  { %780 = vmatprep.subr.bf16.mxu0 %v981_v38 }
 0x2c9   :  { %819 = vset.pattern.permute.xlu1 %v967_v51  ;;  %820 = vset.pattern.permute.xlu0 %v968_v52 }
 0x2ca   :  { %294 = vperm.xlu0 %820, %v265_v48   ;;  %230 = vperm.xlu1 %819, %v221_v50   ;;  %v846_v55 = vpop.eup %845 }
 0x2cb   :  { %v178_v56 = vmul.f32 %v846_v55, %v840_v40  ;;  %v334_v40 = vld [vmem:[#allocation5 + $0x50] sm:$0xff] }
 0x2cc   :  { %v778_v41 = vpack.c.bf16 %v334_v40, %v332_v39  ;;  %v512_v40 = vld [vmem:[%s1219_s5 + $0x18] sm:$0xff] }
 0x2ce   :  { %824 = vset.pattern.permute.xlu0 %v969_v53  ;;  %821 = vset.pattern.permute.xlu1 %v970_v54 }
 0x2cf   :  { %268 = vperm.xlu0 %824, %v265_v48   ;;  %240 = vperm.xlu1 %821, %v221_v50  }
 0x2d0   :  { %779 = vmatpush1.bf16.msra.mxu1 %v778_v41 }
 0x2d1   :  { %786 = vmatprep.subr.bf16.mxu1 %v981_v38 }
 0x2d3   :  { %825 = vset.pattern.permute.xlu0 %v971_v57  ;;  %822 = vset.pattern.permute.xlu1 %v972_v58 }
 0x2d4   :  { %304 = vperm.xlu1 %822, %v265_v48   ;;  %197 = vperm.xlu0 %825, %v178_v56  }
 0x2d8   :  { %823 = vset.pattern.permute.xlu1 %v973_v59  ;;  %827 = vset.pattern.permute.xlu0 %v974_v60 }
 0x2d9   :  { %187 = vperm.xlu1 %823, %v178_v56  }
 0x2dd   :  { %826 = vset.pattern.permute.xlu1 %v975_v61 }
 0x2de   :  { %224 = vperm.xlu1 %826, %v221_v50  }
 0x2e2   :  { %829 = vset.pattern.permute.xlu1 %v970_v54 }
 0x344   :  { %v285_v3 = vpop.permute.xlu1 %284  ;;  %v275_v4 = vpop.permute.xlu0 %274 }
 0x345   :  { %v277_v5 = vmul.f32 %v275_v4, %v1127_v2  ;;  %v287_v6 = vmul.f32 %v285_v3, %v1127_v2 }
 0x347   :  { %279 = vrot.lane.b32.xlu1 %v277_v5, %s976_s19 }
 0x349   :  { %v231_v7 = vpop.permute.xlu1 %230  ;;  %v295_v9 = vpop.permute.xlu0 %294 }
 0x34a   :  { %v233_v8 = vmul.f32 %v231_v7, %v1127_v2  ;;  %v297_v10 = vmul.f32 %v295_v9, %v1127_v2  ;;  %v336_v9 = vld [vmem:[#allocation7] sm:$0x3] }
 0x34b   :  { %289 = vrot.lane.b32.xlu1 %v287_v6, %s977_s20  ;;  %v341_v33 = vrot.slane %v336_v9, %v83_v62 }
 0x34c   :  { %235 = vrot.lane.b32.xlu0 %v233_v8, %s976_s19 }
 0x34e   :  { %v241_v11 = vpop.permute.xlu1 %240  ;;  %v269_v14 = vpop.permute.xlu0 %268 }
 0x34f   :  { %v243_v12 = vmul.f32 %v241_v11, %v1127_v2  ;;  %299 = vrot.lane.b32.xlu1 %v297_v10, %s978_s21  ;;  %v271_v45 = vmul.f32 %v269_v14, %v1127_v2  ;;  %v345_v10 = vrot.slane %v336_v9, %v87_v16  ;;  %v732_v9 = vld [vmem:[%s1222_s8] ss:$0 sm:$0xff] }
 0x351   :  { %245 = vrot.lane.b32.xlu0 %v243_v12, %s977_s20 }
 0x353   :  { %v305_v13 = vpop.permute.xlu1 %304  ;;  %v198_v23 = vpop.permute.xlu0 %197 }
 0x354   :  { %v307_v17 = vmul.f32 %v305_v13, %v1127_v2  ;;  %v200_v32 = vmul.f32 %v198_v23, %v1127_v2 }
 0x355   :  { %181 = vperm.xlu0 %827, %v178_v56  }
 0x356   :  { %309 = vrot.lane.b32.xlu1 %v307_v17, %s979_s22 }
 0x358   :  { %v188_v18 = vpop.permute.xlu1 %187 }
 0x359   :  { %v190_v19 = vmul.f32 %v188_v18, %v1127_v2  ;;  %828 = vset.pattern.permute.xlu0 %v967_v51 }
 0x35b   :  { %192 = vrot.lane.b32.xlu1 %v190_v19, %s976_s19 }
 0x35d   :  { %v225_v34 = vpop.permute.xlu1 %224 }
 0x35e   :  { %v227_v44 = vmul.f32 %v225_v34, %v1127_v2 }
 0x35f   :  { %202 = vrot.lane.b32.xlu1 %v200_v32, %s979_s22 }
 0x3b9   :  { %v280_v37 = vpop.permute.xlu1 %279 }
 0x3ba   :  { %v282_v47 = vadd.f32 %v280_v37, %v271_v45 }
 0x3bd   :  { %v290_v42 = vpop.permute.xlu1 %289 }
 0x3be   :  { %v236_v43 = vpop.permute.xlu0 %235  ;;  %v292_v51 = vadd.f32 %v290_v42, %v282_v47 }
 0x3bf   :  { %v238_v46 = vadd.f32 %v236_v43, %v227_v44 }
 0x3c1   :  { %v300_v49 = vpop.permute.xlu1 %299 }
 0x3c2   :  { %v302_v52 = vadd.f32 %v300_v49, %v292_v51 }
 0x3c3   :  { %v246_v48 = vpop.permute.xlu0 %245 }
 0x3c4   :  { %v248_v50 = vadd.f32 %v246_v48, %v238_v46 }
 0x3c6   :  { %314 = vrot.lane.b32.xlu0 %v248_v50, %s976_s19 }
 0x3c8   :  { %v310_v53 = vpop.permute.xlu1 %309 }
 0x3c9   :  { %v312_v55 = vadd.f32 %v310_v53, %v302_v52 }
 0x3cb   :  { %318 = vrot.lane.b32.xlu1 %v312_v55, %s980_s0 }
 0x3cd   :  { %v193_v58 = vpop.permute.xlu1 %192 }
 0x3d1   :  { %v203_v3 = vpop.permute.xlu1 %202 }
 0x3d4   :  { %v182_v56 = vpop.permute.xlu0 %181 }
 0x3d5   :  { %v184_v63 = vmul.f32 %v182_v56, %v1127_v2 }
 0x3d7   :  { %v195_v1 = vadd.f32 %v193_v58, %v184_v63 }
 0x3d9   :  { %v205_v5 = vadd.f32 %v203_v3, %v195_v1  ;;  %v595_v1 = vld [vmem:[%s1221_s7 + $0x8] sm:$0xff] }
 0x438   :  { %v315_v4 = vpop.permute.xlu0 %314 }
 0x439   :  { %v322_v6 = vsel %vm321_vm5, %v205_v5, %v315_v4  ;;  %v730_v4 = vld [vmem:[%s1220_s6] ss:$0 sm:$0xff]  ;;  %s983_s6 = smov 126  }
 0x43d   :  { %v319_v7 = vpop.permute.xlu1 %318 }
 0x43e   :  { %v323_v8 = vsel %vm91_vm0, %v322_v6, %v319_v7 }
 0x43f   :  { %729 = vmatmul.mubr.msk.f32.vlgmr.msra.gmra.mrb[0].mxu1 %vm348_vm6, %v323_v8 }
 0x440   :  { %757 = vmatprep.mubr.msk.f32.mxu1 %vm982_vm7, %v962_v0  ;;  %v594_v0 = vld [vmem:[%s1221_s7] sm:$0xff]  ;;  %s984_s7 = smov [#allocation8]  }
 0x441   :  { %v787_v3 = vpack.c.bf16 %v595_v1, %v594_v0  ;;  %s718_s8 = sshll.u32 %s984_s7, 4  ;;  %s719_s8 = int_to_ptr.vmem [resolvable:$true] %s718_s8 }
 0x442   :  { %s929_s15 = scalar_lea.vmem %s719_s8, 128  ;;  %p934_p11 = scmp.lt.s32.totalorder %s719_s8, %s719_s8 }
 0x443   :  { %788 = vmatpush3.bf16.msra.mxu1 %v787_v3  ;;  %p930_p10 = scmp.ne.s32.totalorder %s719_s8, %s929_s15  ;;  %p935_p12 = scmp.lt.s32.totalorder %s929_s15, %s929_s15 }
 0x445   :  { %p936_p13 = por %p935_p12, %p934_p11 }
 0x447   :  { %p937_p0 = pnand %p936_p13, %p930_p10 }
 0x512   :  { %v418_v11 = vpop.f32.mrb[0].mxu1 }
 0x513   :  { %v420_v12 = vpop.f32.mrb[1].mxu1  ;;  %v419_v34 = vadd.f32 %v418_v11, %v341_v33 }
 0x514   :  { %v421_v13 = vadd.f32 %v420_v12, %v345_v10 }
 0x516   :  { %v462_v2 = vsel %vm206_vm2, %v421_v13, -inf  ;;  %v424_v20 = vsel %vm167_vm3, %v421_v13, -inf }
 0x517   :  { %463 = vmax.xlane.f32.xlu0 %v462_v2 }
 0x5a4   :  { %v464_v14 = vpop.xlane.xlu0 %463 }
 0x5a5   :  { %v465_v17 = vsub.f32 %v421_v13, %v464_v14 }
 0x5a7   :  { %v466_v18 = vmul.f32 1.442695, %v465_v17 }
 0x5a9   :  { %847 = vpow2.f32 %v466_v18 }
 0x5b3   :  { %v848_v19 = vpop.eup %847 }
 0x5b4   :  { %469 = vrot.lane.b32.xlu1 %v848_v19, %s964_s2 }
 0x5d8   :  { %425 = vmax.xlane.f32.xlu1 %v424_v20 }
 0x626   :  { %v470_v21 = vpop.permute.xlu1 %469 }
 0x627   :  { %v472_v22 = vsel %vm167_vm3, %v470_v21, 0.0 }
 0x628   :  { %473 = vadd.xlane.f32.xlu0 %v472_v22 }
 0x665   :  { %v426_v16 = vpop.xlane.xlu1 %425 }
 0x666   :  { %v427_v23 = vsub.f32 %v421_v13, %v426_v16 }
 0x668   :  { %v428_v24 = vmul.f32 1.442695, %v427_v23 }
 0x66a   :  { %849 = vpow2.f32 %v428_v24 }
 0x674   :  { %v850_v25 = vpop.eup %849 }
 0x675   :  { %v430_v26 = vsel %vm167_vm3, %v850_v25, 0.0 }
 0x676   :  { %431 = vadd.xlane.f32.xlu0 %v430_v26 }
 0x6b5   :  { %v474_v27 = vpop.xlane.xlu0 %473 }
 0x6b6   :  { %851 = vrcp.f32 %v474_v27 }
 0x6c0   :  { %v852_v28 = vpop.eup %851 }
 0x6c1   :  { %v476_v29 = vmul.f32 %v852_v28, %v848_v19 }
 0x6c3   :  { %495 = vperm.xlu1 %829, %v476_v29   ;;  %485 = vperm.xlu0 %828, %v476_v29  }
 0x6c7   :  { %830 = vset.pattern.permute.xlu1 %v973_v59  ;;  %834 = vset.pattern.permute.xlu0 %v970_v54  ;;  %v423_v59 = vmax.f32 %v419_v34, 0.0 }
 0x703   :  { %v432_v30 = vpop.xlane.xlu0 %431 }
 0x704   :  { %853 = vrcp.f32 %v432_v30 }
 0x70e   :  { %v854_v31 = vpop.eup %853 }
 0x70f   :  { %v434_v32 = vmul.f32 %v854_v31, %v850_v25 }
 0x711   :  { %443 = vperm.xlu1 %830, %v434_v32  }
 0x715   :  { %831 = vset.pattern.permute.xlu1 %v975_v61 }
 0x716   :  { %479 = vperm.xlu1 %831, %v476_v29  }
 0x71a   :  { %832 = vset.pattern.permute.xlu1 %v971_v57  ;;  %v509_v57 = vld [vmem:[%s1219_s5] sm:$0xff] }
 0x71b   :  { %453 = vperm.xlu1 %832, %v434_v32   ;;  %v781_v39 = vpack.c.bf16 %v510_v15, %v509_v57 }
 0x71d   :  { %782 = vmatpush3.bf16.msra.mxu0 %v781_v39 }
 0x71e   :  { %783 = vmatprep.subr.bf16.mxu0 %v981_v38 }
 0x71f   :  { %833 = vset.pattern.permute.xlu1 %v974_v60  ;;  %v511_v60 = vld [vmem:[%s1219_s5 + $0x10] sm:$0xff] }
 0x720   :  { %v784_v41 = vpack.c.bf16 %v512_v40, %v511_v60 }
 0x722   :  { %785 = vmatpush3.bf16.msra.mxu0 %v784_v41 }
 0x742   :  { %v486_v35 = vpop.permute.xlu0 %485  ;;  %v496_v36 = vpop.permute.xlu1 %495 }
 0x743   :  { %v488_v54 = vmul.f32 %v486_v35, %v423_v59  ;;  %v498_v37 = vmul.f32 %v496_v36, %v423_v59 }
 0x745   :  { %490 = vrot.lane.b32.xlu1 %v488_v54, %s976_s19 }
 0x749   :  { %500 = vrot.lane.b32.xlu1 %v498_v37, %s977_s20 }
 0x74d   :  { %437 = vperm.xlu1 %833, %v434_v32  }
 0x790   :  { %v444_v61 = vpop.permute.xlu1 %443 }
 0x791   :  { %v446_v62 = vmul.f32 %v444_v61, %v423_v59 }
 0x793   :  { %448 = vrot.lane.b32.xlu1 %v446_v62, %s976_s19 }
 0x795   :  { %v480_v42 = vpop.permute.xlu1 %479 }
 0x796   :  { %v482_v46 = vmul.f32 %v480_v42, %v423_v59 }
 0x79a   :  { %v454_v43 = vpop.permute.xlu1 %453 }
 0x79b   :  { %v456_v44 = vmul.f32 %v454_v43, %v423_v59 }
 0x79d   :  { %458 = vrot.lane.b32.xlu0 %v456_v44, %s979_s22 }
 0x7b7   :  { %v491_v45 = vpop.permute.xlu1 %490 }
 0x7b8   :  { %v493_v47 = vadd.f32 %v491_v45, %v482_v46 }
 0x7bb   :  { %v501_v48 = vpop.permute.xlu1 %500 }
 0x7bc   :  { %v503_v49 = vadd.f32 %v501_v48, %v493_v47 }
 0x7be   :  { %505 = vrot.lane.b32.xlu1 %v503_v49, %s976_s19 }
 0x7cc   :  { %v438_v50 = vpop.permute.xlu1 %437 }
 0x7cd   :  { %v440_v52 = vmul.f32 %v438_v50, %v423_v59 }
 0x805   :  { %v449_v51 = vpop.permute.xlu1 %448 }
 0x806   :  { %v451_v55 = vadd.f32 %v449_v51, %v440_v52 }
 0x80f   :  { %v459_v53 = vpop.permute.xlu0 %458 }
 0x810   :  { %v461_v56 = vadd.f32 %v459_v53, %v451_v55 }
 0x830   :  { %v506_v58 = vpop.permute.xlu1 %505 }
 0x831   :  { %v508_v63 = vsel %vm321_vm5, %v461_v56, %v506_v58 }
 0x832   :  { %751 = vmatmul.mubr.msk.f32.vlgmr.msra.gmra.mrb[2].mxu0 %vm91_vm0, %v508_v63 }
 0x905   :  { %v589_v5 = vpop.f32.mrb[2].mxu0 }
 0x906   :  { %v590_v6 = vadd.f32 %v730_v4, %v589_v5  ;;  %v752_v7 = vpop.f32.mrb[3].mxu0 }
 0x908   :  { %v593_v8 = vmax.f32 %v590_v6, 0.0 }
 0x90a   :  { %758 = vmatmul.mubr.msk.f32.vlgmr.msra.gmra.mrb[2].mxu1 %vm321_vm5, %v593_v8 }
 0x9dd   :  { %v672_v10 = vpop.f32.mrb[2].mxu1 }
 0x9de   :  { %v673_v11 = vadd.f32 %v732_v9, %v672_v10  ;;  %v759_v12 = vpop.f32.mrb[3].mxu1 }
 0x9e0   :  { %v691_v13 = vsel %vm690_vm8, %v673_v11, -inf  ;;  %v677_v2 = vsel %vm676_vm9, %v673_v11, -inf }
 0x9e1   :  { %692 = vmax.xlane.f32.xlu0 %v691_v13  ;;  %678 = vmax.xlane.f32.xlu1 %v677_v2 }
 0xa6e   :  { %v693_v14 = vpop.xlane.xlu0 %692  ;;  %v679_v17 = vpop.xlane.xlu1 %678 }
 0xa6f   :  { %v694_v18 = vsub.f32 %v673_v11, %v693_v14  ;;  %v680_v19 = vsub.f32 %v673_v11, %v679_v17 }
 0xa71   :  { %v695_v20 = vmul.f32 1.442695, %v694_v18  ;;  %v681_v21 = vmul.f32 1.442695, %v680_v19 }
 0xa73   :  { %855 = vpow2.f32 %v695_v20 }
 0xa74   :  { %857 = vpow2.f32 %v681_v21 }
 0xa7d   :  { %v856_v22 = vpop.eup %855 }
 0xa7e   :  { %v858_v16 = vpop.eup %857  ;;  %698 = vrot.lane.b32.xlu0 %v856_v22, %s983_s6 }
 0xa7f   :  { %v683_v23 = vsel %vm676_vm9, %v858_v16, 0.0 }
 0xa80   :  { %684 = vadd.xlane.f32.xlu1 %v683_v23 }
 0xaf0   :  { %v699_v24 = vpop.permute.xlu0 %698 }
 0xaf1   :  { %v701_v25 = vsel %vm676_vm9, %v699_v24, 0.0 }
 0xaf2   :  { %702 = vadd.xlane.f32.xlu1 %v701_v25 }
 0xb0d   :  { %v685_v26 = vpop.xlane.xlu1 %684 }
 0xb0e   :  { %859 = vrcp.f32 %v685_v26 }
 0xb18   :  { %v860_v28 = vpop.eup %859 }
 0xb19   :  { %v687_v29 = vmul.f32 %v860_v28, %v858_v16 }
 0xb1b   :  { %v688_v31 = vmax.f32 %v687_v29, 1e-15 }
 0xb1d   :  { %v689_v34 = vmin.f32 %v688_v31, 1.0 }
 0xb7f   :  { %v703_v27 = vpop.xlane.xlu1 %702 }
 0xb80   :  { %861 = vrcp.f32 %v703_v27 }
 0xb8a   :  { %v862_v30 = vpop.eup %861 }
 0xb8b   :  { %v705_v32 = vmul.f32 %v862_v30, %v856_v22 }
 0xb8d   :  { %v706_v33 = vmax.f32 %v705_v32, 1e-15 }
 0xb8f   :  { %v707_v59 = vmin.f32 %v706_v33, 1.0 }
 0xb91   :  { %v708_v35 = vsel %vm676_vm9, %v689_v34, %v707_v59 }
 0xb92   :  { %v710_v54 = vsel %vm709_vm10, %v708_v35, 0.0 }
 0xb93   :  { %711 = vst [vmem:[#allocation8] sm:$0xff] %v710_v54 }
 0xb94   :  { %940 = shalt.err (!%p937_p0)
}
 0xb95   :  { %s941_s18 = scalar_lea.hbm %s1223_s9, 128 }
 0xb96   :  { %p942_p1 = scmp.ne.s32.totalorder %s1223_s9, %s941_s18  ;;  %p945_p2 = scmp.lt.u32.totalorder %s941_s18, %s1223_s9 }
 0xb98   :  { %p947_p3 = pnand %p945_p2, %p942_p1 }
 0xb9a   :  { %950 = shalt.err (!%p947_p3)
}
 0xb9b   :  { %721 = dma.vmem_to_hbm [thread:$0]  %s719_s8, 128, %s1223_s9, [#allocation4]  }
 0xb9c   :  { %955 = dma.done.wait [#allocation4], 128  }
 0xb9d   :  { %956 = vsyncadd [#allocation4], 4294967168 }
 0xb9e   :  { %725 = vsyncpa [#allocation3], 1 }
 0xb9f   :  { %726 = vsyncpa [#allocation6], 1 }
 0xba0   :  { %727 = vsyncpa [#allocation4], 1 }

</bundles_post_ra>
